<compile_context>
chip_gen: v7x
topology: tpu7x:2x2x1
jax: 0.10.0
libtpu: 0.0.40
codegen_flags: <defaults>
</compile_context>

<pallas_src>
import numpy as np
import jax
import jax.numpy as jnp
from jax import lax
from jax.experimental import pallas as pl
from jax.experimental.pallas import tpu as pltpu

# ---- small, module-consistent config ----
B = 2            # batch_size
T = 8            # total_points
OBS = 5          # obs_points
K = T - OBS      # test points per batch row
H = 32           # LO_hidden_size
D = 32           # OF_layer_dim
OBSRV_STD = 0.01
NSUB = 4         # RK4 substeps per observation interval

_LOG_2PI = float(np.log(2.0 * np.pi))
_LOG_OBS_STD = float(np.log(OBSRV_STD))


def latent_ode_kernel(dt_ref, klc_ref,                       # SMEM scalars
                      mean_ref, std_ref, r_ref, tgt_ref,
                      w1_ref, b1_ref, w2_ref, b2_ref, w3_ref, b3_ref,
                      wot_ref, bo_ref,                        # VMEM inputs
                      masked_out_ref, loss_ref, mse_ref,      # outputs
                      ztraj_scr):                             # VMEM scratch (K,B,H)
    # Weights loaded once and cast once to bf16 for the MXU; bias broadcasts
    # hoisted out of all ode_f call sites (JAX does not CSE broadcast_in_dim).
    w1 = w1_ref[...].astype(jnp.bfloat16)
    w2 = w2_ref[...].astype(jnp.bfloat16)
    w3 = w3_ref[...].astype(jnp.bfloat16)
    b1b = jnp.broadcast_to(b1_ref[...], (B, D))
    b2b = jnp.broadcast_to(b2_ref[...], (B, D))
    b3b = jnp.broadcast_to(b3_ref[...], (B, H))

    def ode_f(z):
        # LO_ODE_Func: Linear -> tanh -> Linear -> tanh -> Linear
        # (dot operands bf16, accumulation + nonlinearity + combine in f32)
        x = jnp.tanh(jnp.dot(z.astype(jnp.bfloat16), w1,
                             preferred_element_type=jnp.float32) + b1b)
        x = jnp.tanh(jnp.dot(x.astype(jnp.bfloat16), w2,
                             preferred_element_type=jnp.float32) + b2b)
        return jnp.dot(x.astype(jnp.bfloat16), w3,
                       preferred_element_type=jnp.float32) + b3b

    mean = mean_ref[...]
    std = std_ref[...]

    # z0 = mean + r * std   (reparameterized sample)
    z0 = mean + r_ref[...] * std

    def interval_body(i, z):
        h = dt_ref[i] / jnp.float32(NSUB)
        half_h = 0.5 * h
        sixth_h = h * jnp.float32(1.0 / 6.0)

        def rk4_sub(_, zz):
            k1 = ode_f(zz)
            k2 = ode_f(zz + half_h * k1)
            k3 = ode_f(zz + half_h * k2)
            k4 = ode_f(zz + h * k3)
            return zz + sixth_h * (k1 + 2.0 * (k2 + k3) + k4)

        # inner loop unrolled (short, fixed trip count -> LLO overlap);
        # outer loop stays rolled to avoid spill cliffs / compile-time blowup.
        z = lax.fori_loop(0, NSUB, rk4_sub, z, unroll=True)

        # only the test-time states feed the readout / loss
        @pl.when(i >= OBS)
        def _():
            ztraj_scr[i - OBS] = z

        return z

    lax.fori_loop(1, T, interval_body, z0)

    # Deferred batched readout (off the serialized critical path):
    # masked[b, k] = z(t_{OBS+k})[b, :] . Wout + bout  via VPU mul + lane reduce.
    wo = wot_ref[...]                                         # (1, H) pre-transposed
    zs = ztraj_scr[...]                                       # (K, B, H)
    cols = [jnp.sum(zs[k] * wo, axis=-1, keepdims=True) for k in range(K)]  # (B,1) each
    masked = jnp.concatenate(cols, axis=1) + bo_ref[...]      # (B, K)
    masked_out_ref[...] = masked

    tgt = tgt_ref[...]                                        # (B, K)
    diff = masked - tgt

    # KL( N(mean, std) || N(0, 1) ), then mean over hidden dim
    kl = -jnp.log(std) + 0.5 * (std * std + mean * mean - 1.0)  # (B, H)
    kl_div = jnp.mean(kl, axis=1, keepdims=True)                # (B, 1)

    # Independent(Normal(masked, obsrv_std), 1).log_prob(target)
    elem_lp = (-0.5 * _LOG_2PI - _LOG_OBS_STD
               - 0.5 * (diff / OBSRV_STD) ** 2)                 # (B, K)
    log_prob = jnp.sum(elem_lp, axis=1, keepdims=True)          # (B, 1)
    # reference divides by output.shape[1] == total_points (T), not by K
    likelihood = log_prob / jnp.float32(T)

    # loss = -logsumexp(likelihood - kl_coef * kl_div, over batch) as in
    # reference (no -log(B) term in the PyTorch code).
    arg = likelihood - klc_ref[0] * kl_div                      # (B, 1)
    mmax = jnp.max(arg)
    loss = -(mmax + jnp.log(jnp.sum(jnp.exp(arg - mmax))))
    mse = jnp.mean(diff * diff)

    loss_ref[0] = loss
    mse_ref[0] = mse


def latent_ode_forward(b, test_m_np, mean, std, r, kl_coef, params):
    """params = dict of (W1,b1,W2,b2,W3,b3,Wout,bout)."""
    times = b[0, :, 0]
    dt = jnp.concatenate(
        [jnp.zeros((1,), jnp.float32),
         (times[1:] - times[:-1]).astype(jnp.float32)])

    # kernel assumes test points are the contiguous tail [OBS, T) for all rows
    tail = np.arange(OBS, T)
    for bi in range(B):
        idx = np.nonzero(test_m_np[bi])[0]
        assert idx.shape[0] == K and np.array_equal(idx, tail), \
            "kernel specialization: test mask must be the contiguous tail"

    # target = b[:, :, 1][test_m].reshape(B, K)
    target = b[:, OBS:, 1].astype(jnp.float32)                 # (B, K)

    klc = jnp.asarray([kl_coef], jnp.float32)
    wout_t = jnp.transpose(params["Wout"])                     # (1, H) for VPU readout

    smem_spec = pl.BlockSpec(memory_space=pltpu.MemorySpace.SMEM)
    vmem_spec = pl.BlockSpec(memory_space=pltpu.MemorySpace.VMEM)

    fn = pl.pallas_call(
        latent_ode_kernel,
        out_shape=(
            jax.ShapeDtypeStruct((B, K), jnp.float32),   # masked_output
            jax.ShapeDtypeStruct((1,), jnp.float32),     # loss
            jax.ShapeDtypeStruct((1,), jnp.float32),     # mse
        ),
        in_specs=[smem_spec, smem_spec] + [vmem_spec] * 12,
        out_specs=(vmem_spec, smem_spec, smem_spec),
        scratch_shapes=[pltpu.VMEM((K, B, H), jnp.float32)],
    )

    masked_output, loss, mse = fn(
        dt, klc, mean, std, r, target,
        params["W1"], params["b1"], params["W2"], params["b2"],
        params["W3"], params["b3"], wout_t, params["bout"])
    return loss[0], mse[0], masked_output


def init_params(key):
    ks = jax.random.split(key, 8)

    def lin(kw, kb, fan_in, fan_out):
        bound = 1.0 / np.sqrt(fan_in)
        W = jax.random.uniform(kw, (fan_in, fan_out), jnp.float32, -bound, bound)
        bias = jax.random.uniform(kb, (1, fan_out), jnp.float32, -bound, bound)
        return W, bias

    W1, b1 = lin(ks[0], ks[1], H, D)
    W2, b2 = lin(ks[2], ks[3], D, D)
    W3, b3 = lin(ks[4], ks[5], D, H)
    Wout, bout = lin(ks[6], ks[7], H, 1)
    return dict(W1=W1, b1=b1, W2=W2, b2=b2, W3=W3, b3=b3, Wout=Wout, bout=bout)


if __name__ == "__main__":
    key = jax.random.PRNGKey(0)
    k_param, k_val, k_mean, k_std, k_r = jax.random.split(key, 5)

    params = init_params(k_param)

    # input tuple pieces: b (B, T, 2) with [:,:,0]=times, [:,:,1]=values; masks (B, T)
    times = jnp.linspace(0.0, 1.0, T).astype(jnp.float32)
    values = (jnp.sin(2.0 * np.pi * times)[None, :]
              + 0.1 * jax.random.normal(k_val, (B, T))).astype(jnp.float32)
    b = jnp.stack([jnp.broadcast_to(times, (B, T)), values], axis=-1)

    m = np.ones((B, T), np.float32)
    train_m = np.zeros((B, T), np.float32); train_m[:, :OBS] = 1.0
    test_m = np.zeros((B, T), np.float32); test_m[:, OBS:] = 1.0

    # stand-in for ODE_RNN encoder output (see TODO(synk) above)
    mean = (0.1 * jax.random.normal(k_mean, (B, H))).astype(jnp.float32)
    std = (0.05 + 0.1 * jax.nn.sigmoid(jax.random.normal(k_std, (B, H)))).astype(jnp.float32)
    # r = Normal(0,1).sample(mean.shape).squeeze(-1)
    r = jax.random.normal(k_r, (B, H)).astype(jnp.float32)

    kl_coef = 0.1

    loss, mse, masked_output = latent_ode_forward(b, test_m, mean, std, r, kl_coef, params)
    jax.block_until_ready((loss, mse, masked_output))
    assert masked_output.shape == (B, K)
    assert jnp.isfinite(loss) and jnp.isfinite(mse)
    print("KERNEL_OK")
</pallas_src>

<mosaic_0001>
module attributes {stable_mosaic.version = 11 : i64} {
  func.func @latent_ode_kernel(%arg0: memref<8xf32, #tpu.memory_space<smem>>, %arg1: memref<1xf32, #tpu.memory_space<smem>>, %arg2: memref<2x32xf32, #tpu.memory_space<vmem>>, %arg3: memref<2x32xf32, #tpu.memory_space<vmem>>, %arg4: memref<2x32xf32, #tpu.memory_space<vmem>>, %arg5: memref<2x3xf32, #tpu.memory_space<vmem>>, %arg6: memref<32x32xf32, #tpu.memory_space<vmem>>, %arg7: memref<1x32xf32, #tpu.memory_space<vmem>>, %arg8: memref<32x32xf32, #tpu.memory_space<vmem>>, %arg9: memref<1x32xf32, #tpu.memory_space<vmem>>, %arg10: memref<32x32xf32, #tpu.memory_space<vmem>>, %arg11: memref<1x32xf32, #tpu.memory_space<vmem>>, %arg12: memref<1x32xf32, #tpu.memory_space<vmem>>, %arg13: memref<1x1xf32, #tpu.memory_space<vmem>>, %arg14: memref<2x3xf32, #tpu.memory_space<vmem>>, %arg15: memref<1xf32, #tpu.memory_space<smem>>, %arg16: memref<1xf32, #tpu.memory_space<smem>>, %arg17: memref<3x2x32xf32, #tpu.memory_space<vmem>>) attributes {dimension_semantics = [], scalar_prefetch = 0 : i64, scratch_operands = 1 : i64, tpu.core_type = #tpu.core_type<tc>} {
    %c0 = arith.constant 0 : index
    %c0_0 = arith.constant 0 : index
    %0 = vector.load %arg6[%c0, %c0_0] : memref<32x32xf32, #tpu.memory_space<vmem>>, vector<32x32xf32>
    %1 = arith.truncf %0 : vector<32x32xf32> to vector<32x32xbf16>
    %c0_1 = arith.constant 0 : index
    %c0_2 = arith.constant 0 : index
    %2 = vector.load %arg8[%c0_1, %c0_2] : memref<32x32xf32, #tpu.memory_space<vmem>>, vector<32x32xf32>
    %3 = arith.truncf %2 : vector<32x32xf32> to vector<32x32xbf16>
    %c0_3 = arith.constant 0 : index
    %c0_4 = arith.constant 0 : index
    %4 = vector.load %arg10[%c0_3, %c0_4] : memref<32x32xf32, #tpu.memory_space<vmem>>, vector<32x32xf32>
    %5 = arith.truncf %4 : vector<32x32xf32> to vector<32x32xbf16>
    %c0_5 = arith.constant 0 : index
    %c0_6 = arith.constant 0 : index
    %6 = vector.load %arg7[%c0_5, %c0_6] : memref<1x32xf32, #tpu.memory_space<vmem>>, vector<1x32xf32>
    %7 = vector.shape_cast %6 : vector<1x32xf32> to vector<1x32xf32>
    %8 = vector.broadcast %7 : vector<1x32xf32> to vector<2x32xf32>
    %c0_7 = arith.constant 0 : index
    %c0_8 = arith.constant 0 : index
    %9 = vector.load %arg9[%c0_7, %c0_8] : memref<1x32xf32, #tpu.memory_space<vmem>>, vector<1x32xf32>
    %10 = vector.shape_cast %9 : vector<1x32xf32> to vector<1x32xf32>
    %11 = vector.broadcast %10 : vector<1x32xf32> to vector<2x32xf32>
    %c0_9 = arith.constant 0 : index
    %c0_10 = arith.constant 0 : index
    %12 = vector.load %arg11[%c0_9, %c0_10] : memref<1x32xf32, #tpu.memory_space<vmem>>, vector<1x32xf32>
    %13 = vector.shape_cast %12 : vector<1x32xf32> to vector<1x32xf32>
    %14 = vector.broadcast %13 : vector<1x32xf32> to vector<2x32xf32>
    %c0_11 = arith.constant 0 : index
    %c0_12 = arith.constant 0 : index
    %15 = vector.load %arg2[%c0_11, %c0_12] : memref<2x32xf32, #tpu.memory_space<vmem>>, vector<2x32xf32>
    %c0_13 = arith.constant 0 : index
    %c0_14 = arith.constant 0 : index
    %16 = vector.load %arg3[%c0_13, %c0_14] : memref<2x32xf32, #tpu.memory_space<vmem>>, vector<2x32xf32>
    %c0_15 = arith.constant 0 : index
    %c0_16 = arith.constant 0 : index
    %17 = vector.load %arg4[%c0_15, %c0_16] : memref<2x32xf32, #tpu.memory_space<vmem>>, vector<2x32xf32>
    %18 = arith.mulf %17, %16 : vector<2x32xf32>
    %19 = arith.addf %15, %18 : vector<2x32xf32>
    %c1_i32 = arith.constant 1 : i32
    %c7_i32 = arith.constant 7 : i32
    %20 = arith.addi %c1_i32, %c7_i32 : i32
    %c1_i32_17 = arith.constant 1 : i32
    %21 = scf.for %arg18 = %c1_i32 to %20 step %c1_i32_17 iter_args(%arg19 = %19) -> (vector<2x32xf32>)  : i32 {
      %101 = arith.index_cast %arg18 : i32 to index
      %102 = memref.load %arg0[%101] : memref<8xf32, #tpu.memory_space<smem>>
      %cst_50 = arith.constant 4.000000e+00 : f32
      %103 = arith.divf %102, %cst_50 : f32
      %cst_51 = arith.constant 5.000000e-01 : f32
      %104 = arith.mulf %cst_51, %103 : f32
      %cst_52 = arith.constant 0.166666672 : f32
      %105 = arith.mulf %103, %cst_52 : f32
      %c0_i32 = arith.constant 0 : i32
      %106 = arith.truncf %arg19 : vector<2x32xf32> to vector<2x32xbf16>
      %cst_53 = arith.constant dense<0.000000e+00> : vector<2x32xf32>
      %107 = tpu.matmul %106, %1, %cst_53 {dimension_numbers = #tpu.dot_dimension_numbers<[1], [0], [0], [1], [0, 0, 1, 1], [], []>} : vector<2x32xbf16>, vector<32x32xbf16>, vector<2x32xf32> -> vector<2x32xf32>
      %108 = arith.addf %107, %8 : vector<2x32xf32>
      %109 = math.tanh %108 : vector<2x32xf32>
      %110 = arith.truncf %109 : vector<2x32xf32> to vector<2x32xbf16>
      %cst_54 = arith.constant dense<0.000000e+00> : vector<2x32xf32>
      %111 = tpu.matmul %110, %3, %cst_54 {dimension_numbers = #tpu.dot_dimension_numbers<[1], [0], [0], [1], [0, 0, 1, 1], [], []>} : vector<2x32xbf16>, vector<32x32xbf16>, vector<2x32xf32> -> vector<2x32xf32>
      %112 = arith.addf %111, %11 : vector<2x32xf32>
      %113 = math.tanh %112 : vector<2x32xf32>
      %114 = arith.truncf %113 : vector<2x32xf32> to vector<2x32xbf16>
      %cst_55 = arith.constant dense<0.000000e+00> : vector<2x32xf32>
      %115 = tpu.matmul %114, %5, %cst_55 {dimension_numbers = #tpu.dot_dimension_numbers<[1], [0], [0], [1], [0, 0, 1, 1], [], []>} : vector<2x32xbf16>, vector<32x32xbf16>, vector<2x32xf32> -> vector<2x32xf32>
      %116 = arith.addf %115, %14 : vector<2x32xf32>
      %117 = vector.broadcast %104 : f32 to vector<2x32xf32>
      %118 = arith.mulf %117, %116 : vector<2x32xf32>
      %119 = arith.addf %arg19, %118 : vector<2x32xf32>
      %120 = arith.truncf %119 : vector<2x32xf32> to vector<2x32xbf16>
      %cst_56 = arith.constant dense<0.000000e+00> : vector<2x32xf32>
      %121 = tpu.matmul %120, %1, %cst_56 {dimension_numbers = #tpu.dot_dimension_numbers<[1], [0], [0], [1], [0, 0, 1, 1], [], []>} : vector<2x32xbf16>, vector<32x32xbf16>, vector<2x32xf32> -> vector<2x32xf32>
      %122 = arith.addf %121, %8 : vector<2x32xf32>
      %123 = math.tanh %122 : vector<2x32xf32>
      %124 = arith.truncf %123 : vector<2x32xf32> to vector<2x32xbf16>
      %cst_57 = arith.constant dense<0.000000e+00> : vector<2x32xf32>
      %125 = tpu.matmul %124, %3, %cst_57 {dimension_numbers = #tpu.dot_dimension_numbers<[1], [0], [0], [1], [0, 0, 1, 1], [], []>} : vector<2x32xbf16>, vector<32x32xbf16>, vector<2x32xf32> -> vector<2x32xf32>
      %126 = arith.addf %125, %11 : vector<2x32xf32>
      %127 = math.tanh %126 : vector<2x32xf32>
      %128 = arith.truncf %127 : vector<2x32xf32> to vector<2x32xbf16>
      %cst_58 = arith.constant dense<0.000000e+00> : vector<2x32xf32>
      %129 = tpu.matmul %128, %5, %cst_58 {dimension_numbers = #tpu.dot_dimension_numbers<[1], [0], [0], [1], [0, 0, 1, 1], [], []>} : vector<2x32xbf16>, vector<32x32xbf16>, vector<2x32xf32> -> vector<2x32xf32>
      %130 = arith.addf %129, %14 : vector<2x32xf32>
      %131 = vector.broadcast %104 : f32 to vector<2x32xf32>
      %132 = arith.mulf %131, %130 : vector<2x32xf32>
      %133 = arith.addf %arg19, %132 : vector<2x32xf32>
      %134 = arith.truncf %133 : vector<2x32xf32> to vector<2x32xbf16>
      %cst_59 = arith.constant dense<0.000000e+00> : vector<2x32xf32>
      %135 = tpu.matmul %134, %1, %cst_59 {dimension_numbers = #tpu.dot_dimension_numbers<[1], [0], [0], [1], [0, 0, 1, 1], [], []>} : vector<2x32xbf16>, vector<32x32xbf16>, vector<2x32xf32> -> vector<2x32xf32>
      %136 = arith.addf %135, %8 : vector<2x32xf32>
      %137 = math.tanh %136 : vector<2x32xf32>
      %138 = arith.truncf %137 : vector<2x32xf32> to vector<2x32xbf16>
      %cst_60 = arith.constant dense<0.000000e+00> : vector<2x32xf32>
      %139 = tpu.matmul %138, %3, %cst_60 {dimension_numbers = #tpu.dot_dimension_numbers<[1], [0], [0], [1], [0, 0, 1, 1], [], []>} : vector<2x32xbf16>, vector<32x32xbf16>, vector<2x32xf32> -> vector<2x32xf32>
      %140 = arith.addf %139, %11 : vector<2x32xf32>
      %141 = math.tanh %140 : vector<2x32xf32>
      %142 = arith.truncf %141 : vector<2x32xf32> to vector<2x32xbf16>
      %cst_61 = arith.constant dense<0.000000e+00> : vector<2x32xf32>
      %143 = tpu.matmul %142, %5, %cst_61 {dimension_numbers = #tpu.dot_dimension_numbers<[1], [0], [0], [1], [0, 0, 1, 1], [], []>} : vector<2x32xbf16>, vector<32x32xbf16>, vector<2x32xf32> -> vector<2x32xf32>
      %144 = arith.addf %143, %14 : vector<2x32xf32>
      %145 = vector.broadcast %103 : f32 to vector<2x32xf32>
      %146 = arith.mulf %145, %144 : vector<2x32xf32>
      %147 = arith.addf %arg19, %146 : vector<2x32xf32>
      %148 = arith.truncf %147 : vector<2x32xf32> to vector<2x32xbf16>
      %cst_62 = arith.constant dense<0.000000e+00> : vector<2x32xf32>
      %149 = tpu.matmul %148, %1, %cst_62 {dimension_numbers = #tpu.dot_dimension_numbers<[1], [0], [0], [1], [0, 0, 1, 1], [], []>} : vector<2x32xbf16>, vector<32x32xbf16>, vector<2x32xf32> -> vector<2x32xf32>
      %150 = arith.addf %149, %8 : vector<2x32xf32>
      %151 = math.tanh %150 : vector<2x32xf32>
      %152 = arith.truncf %151 : vector<2x32xf32> to vector<2x32xbf16>
      %cst_63 = arith.constant dense<0.000000e+00> : vector<2x32xf32>
      %153 = tpu.matmul %152, %3, %cst_63 {dimension_numbers = #tpu.dot_dimension_numbers<[1], [0], [0], [1], [0, 0, 1, 1], [], []>} : vector<2x32xbf16>, vector<32x32xbf16>, vector<2x32xf32> -> vector<2x32xf32>
      %154 = arith.addf %153, %11 : vector<2x32xf32>
      %155 = math.tanh %154 : vector<2x32xf32>
      %156 = arith.truncf %155 : vector<2x32xf32> to vector<2x32xbf16>
      %cst_64 = arith.constant dense<0.000000e+00> : vector<2x32xf32>
      %157 = tpu.matmul %156, %5, %cst_64 {dimension_numbers = #tpu.dot_dimension_numbers<[1], [0], [0], [1], [0, 0, 1, 1], [], []>} : vector<2x32xbf16>, vector<32x32xbf16>, vector<2x32xf32> -> vector<2x32xf32>
      %158 = arith.addf %157, %14 : vector<2x32xf32>
      %159 = arith.addf %130, %144 : vector<2x32xf32>
      %cst_65 = arith.constant 2.000000e+00 : f32
      %160 = vector.broadcast %cst_65 : f32 to vector<2x32xf32>
      %161 = arith.mulf %160, %159 : vector<2x32xf32>
      %162 = arith.addf %116, %161 : vector<2x32xf32>
      %163 = arith.addf %162, %158 : vector<2x32xf32>
      %164 = vector.broadcast %105 : f32 to vector<2x32xf32>
      %165 = arith.mulf %164, %163 : vector<2x32xf32>
      %166 = arith.addf %arg19, %165 : vector<2x32xf32>
      %c1_i32_66 = arith.constant 1 : i32
      %167 = arith.truncf %166 : vector<2x32xf32> to vector<2x32xbf16>
      %cst_67 = arith.constant dense<0.000000e+00> : vector<2x32xf32>
      %168 = tpu.matmul %167, %1, %cst_67 {dimension_numbers = #tpu.dot_dimension_numbers<[1], [0], [0], [1], [0, 0, 1, 1], [], []>} : vector<2x32xbf16>, vector<32x32xbf16>, vector<2x32xf32> -> vector<2x32xf32>
      %169 = arith.addf %168, %8 : vector<2x32xf32>
      %170 = math.tanh %169 : vector<2x32xf32>
      %171 = arith.truncf %170 : vector<2x32xf32> to vector<2x32xbf16>
      %cst_68 = arith.constant dense<0.000000e+00> : vector<2x32xf32>
      %172 = tpu.matmul %171, %3, %cst_68 {dimension_numbers = #tpu.dot_dimension_numbers<[1], [0], [0], [1], [0, 0, 1, 1], [], []>} : vector<2x32xbf16>, vector<32x32xbf16>, vector<2x32xf32> -> vector<2x32xf32>
      %173 = arith.addf %172, %11 : vector<2x32xf32>
      %174 = math.tanh %173 : vector<2x32xf32>
      %175 = arith.truncf %174 : vector<2x32xf32> to vector<2x32xbf16>
      %cst_69 = arith.constant dense<0.000000e+00> : vector<2x32xf32>
      %176 = tpu.matmul %175, %5, %cst_69 {dimension_numbers = #tpu.dot_dimension_numbers<[1], [0], [0], [1], [0, 0, 1, 1], [], []>} : vector<2x32xbf16>, vector<32x32xbf16>, vector<2x32xf32> -> vector<2x32xf32>
      %177 = arith.addf %176, %14 : vector<2x32xf32>
      %178 = vector.broadcast %104 : f32 to vector<2x32xf32>
      %179 = arith.mulf %178, %177 : vector<2x32xf32>
      %180 = arith.addf %166, %179 : vector<2x32xf32>
      %181 = arith.truncf %180 : vector<2x32xf32> to vector<2x32xbf16>
      %cst_70 = arith.constant dense<0.000000e+00> : vector<2x32xf32>
      %182 = tpu.matmul %181, %1, %cst_70 {dimension_numbers = #tpu.dot_dimension_numbers<[1], [0], [0], [1], [0, 0, 1, 1], [], []>} : vector<2x32xbf16>, vector<32x32xbf16>, vector<2x32xf32> -> vector<2x32xf32>
      %183 = arith.addf %182, %8 : vector<2x32xf32>
      %184 = math.tanh %183 : vector<2x32xf32>
      %185 = arith.truncf %184 : vector<2x32xf32> to vector<2x32xbf16>
      %cst_71 = arith.constant dense<0.000000e+00> : vector<2x32xf32>
      %186 = tpu.matmul %185, %3, %cst_71 {dimension_numbers = #tpu.dot_dimension_numbers<[1], [0], [0], [1], [0, 0, 1, 1], [], []>} : vector<2x32xbf16>, vector<32x32xbf16>, vector<2x32xf32> -> vector<2x32xf32>
      %187 = arith.addf %186, %11 : vector<2x32xf32>
      %188 = math.tanh %187 : vector<2x32xf32>
      %189 = arith.truncf %188 : vector<2x32xf32> to vector<2x32xbf16>
      %cst_72 = arith.constant dense<0.000000e+00> : vector<2x32xf32>
      %190 = tpu.matmul %189, %5, %cst_72 {dimension_numbers = #tpu.dot_dimension_numbers<[1], [0], [0], [1], [0, 0, 1, 1], [], []>} : vector<2x32xbf16>, vector<32x32xbf16>, vector<2x32xf32> -> vector<2x32xf32>
      %191 = arith.addf %190, %14 : vector<2x32xf32>
      %192 = vector.broadcast %104 : f32 to vector<2x32xf32>
      %193 = arith.mulf %192, %191 : vector<2x32xf32>
      %194 = arith.addf %166, %193 : vector<2x32xf32>
      %195 = arith.truncf %194 : vector<2x32xf32> to vector<2x32xbf16>
      %cst_73 = arith.constant dense<0.000000e+00> : vector<2x32xf32>
      %196 = tpu.matmul %195, %1, %cst_73 {dimension_numbers = #tpu.dot_dimension_numbers<[1], [0], [0], [1], [0, 0, 1, 1], [], []>} : vector<2x32xbf16>, vector<32x32xbf16>, vector<2x32xf32> -> vector<2x32xf32>
      %197 = arith.addf %196, %8 : vector<2x32xf32>
      %198 = math.tanh %197 : vector<2x32xf32>
      %199 = arith.truncf %198 : vector<2x32xf32> to vector<2x32xbf16>
      %cst_74 = arith.constant dense<0.000000e+00> : vector<2x32xf32>
      %200 = tpu.matmul %199, %3, %cst_74 {dimension_numbers = #tpu.dot_dimension_numbers<[1], [0], [0], [1], [0, 0, 1, 1], [], []>} : vector<2x32xbf16>, vector<32x32xbf16>, vector<2x32xf32> -> vector<2x32xf32>
      %201 = arith.addf %200, %11 : vector<2x32xf32>
      %202 = math.tanh %201 : vector<2x32xf32>
      %203 = arith.truncf %202 : vector<2x32xf32> to vector<2x32xbf16>
      %cst_75 = arith.constant dense<0.000000e+00> : vector<2x32xf32>
      %204 = tpu.matmul %203, %5, %cst_75 {dimension_numbers = #tpu.dot_dimension_numbers<[1], [0], [0], [1], [0, 0, 1, 1], [], []>} : vector<2x32xbf16>, vector<32x32xbf16>, vector<2x32xf32> -> vector<2x32xf32>
      %205 = arith.addf %204, %14 : vector<2x32xf32>
      %206 = vector.broadcast %103 : f32 to vector<2x32xf32>
      %207 = arith.mulf %206, %205 : vector<2x32xf32>
      %208 = arith.addf %166, %207 : vector<2x32xf32>
      %209 = arith.truncf %208 : vector<2x32xf32> to vector<2x32xbf16>
      %cst_76 = arith.constant dense<0.000000e+00> : vector<2x32xf32>
      %210 = tpu.matmul %209, %1, %cst_76 {dimension_numbers = #tpu.dot_dimension_numbers<[1], [0], [0], [1], [0, 0, 1, 1], [], []>} : vector<2x32xbf16>, vector<32x32xbf16>, vector<2x32xf32> -> vector<2x32xf32>
      %211 = arith.addf %210, %8 : vector<2x32xf32>
      %212 = math.tanh %211 : vector<2x32xf32>
      %213 = arith.truncf %212 : vector<2x32xf32> to vector<2x32xbf16>
      %cst_77 = arith.constant dense<0.000000e+00> : vector<2x32xf32>
      %214 = tpu.matmul %213, %3, %cst_77 {dimension_numbers = #tpu.dot_dimension_numbers<[1], [0], [0], [1], [0, 0, 1, 1], [], []>} : vector<2x32xbf16>, vector<32x32xbf16>, vector<2x32xf32> -> vector<2x32xf32>
      %215 = arith.addf %214, %11 : vector<2x32xf32>
      %216 = math.tanh %215 : vector<2x32xf32>
      %217 = arith.truncf %216 : vector<2x32xf32> to vector<2x32xbf16>
      %cst_78 = arith.constant dense<0.000000e+00> : vector<2x32xf32>
      %218 = tpu.matmul %217, %5, %cst_78 {dimension_numbers = #tpu.dot_dimension_numbers<[1], [0], [0], [1], [0, 0, 1, 1], [], []>} : vector<2x32xbf16>, vector<32x32xbf16>, vector<2x32xf32> -> vector<2x32xf32>
      %219 = arith.addf %218, %14 : vector<2x32xf32>
      %220 = arith.addf %191, %205 : vector<2x32xf32>
      %cst_79 = arith.constant 2.000000e+00 : f32
      %221 = vector.broadcast %cst_79 : f32 to vector<2x32xf32>
      %222 = arith.mulf %221, %220 : vector<2x32xf32>
      %223 = arith.addf %177, %222 : vector<2x32xf32>
      %224 = arith.addf %223, %219 : vector<2x32xf32>
      %225 = vector.broadcast %105 : f32 to vector<2x32xf32>
      %226 = arith.mulf %225, %224 : vector<2x32xf32>
      %227 = arith.addf %166, %226 : vector<2x32xf32>
      %c2_i32 = arith.constant 2 : i32
      %228 = arith.truncf %227 : vector<2x32xf32> to vector<2x32xbf16>
      %cst_80 = arith.constant dense<0.000000e+00> : vector<2x32xf32>
      %229 = tpu.matmul %228, %1, %cst_80 {dimension_numbers = #tpu.dot_dimension_numbers<[1], [0], [0], [1], [0, 0, 1, 1], [], []>} : vector<2x32xbf16>, vector<32x32xbf16>, vector<2x32xf32> -> vector<2x32xf32>
      %230 = arith.addf %229, %8 : vector<2x32xf32>
      %231 = math.tanh %230 : vector<2x32xf32>
      %232 = arith.truncf %231 : vector<2x32xf32> to vector<2x32xbf16>
      %cst_81 = arith.constant dense<0.000000e+00> : vector<2x32xf32>
      %233 = tpu.matmul %232, %3, %cst_81 {dimension_numbers = #tpu.dot_dimension_numbers<[1], [0], [0], [1], [0, 0, 1, 1], [], []>} : vector<2x32xbf16>, vector<32x32xbf16>, vector<2x32xf32> -> vector<2x32xf32>
      %234 = arith.addf %233, %11 : vector<2x32xf32>
      %235 = math.tanh %234 : vector<2x32xf32>
      %236 = arith.truncf %235 : vector<2x32xf32> to vector<2x32xbf16>
      %cst_82 = arith.constant dense<0.000000e+00> : vector<2x32xf32>
      %237 = tpu.matmul %236, %5, %cst_82 {dimension_numbers = #tpu.dot_dimension_numbers<[1], [0], [0], [1], [0, 0, 1, 1], [], []>} : vector<2x32xbf16>, vector<32x32xbf16>, vector<2x32xf32> -> vector<2x32xf32>
      %238 = arith.addf %237, %14 : vector<2x32xf32>
      %239 = vector.broadcast %104 : f32 to vector<2x32xf32>
      %240 = arith.mulf %239, %238 : vector<2x32xf32>
      %241 = arith.addf %227, %240 : vector<2x32xf32>
      %242 = arith.truncf %241 : vector<2x32xf32> to vector<2x32xbf16>
      %cst_83 = arith.constant dense<0.000000e+00> : vector<2x32xf32>
      %243 = tpu.matmul %242, %1, %cst_83 {dimension_numbers = #tpu.dot_dimension_numbers<[1], [0], [0], [1], [0, 0, 1, 1], [], []>} : vector<2x32xbf16>, vector<32x32xbf16>, vector<2x32xf32> -> vector<2x32xf32>
      %244 = arith.addf %243, %8 : vector<2x32xf32>
      %245 = math.tanh %244 : vector<2x32xf32>
      %246 = arith.truncf %245 : vector<2x32xf32> to vector<2x32xbf16>
      %cst_84 = arith.constant dense<0.000000e+00> : vector<2x32xf32>
      %247 = tpu.matmul %246, %3, %cst_84 {dimension_numbers = #tpu.dot_dimension_numbers<[1], [0], [0], [1], [0, 0, 1, 1], [], []>} : vector<2x32xbf16>, vector<32x32xbf16>, vector<2x32xf32> -> vector<2x32xf32>
      %248 = arith.addf %247, %11 : vector<2x32xf32>
      %249 = math.tanh %248 : vector<2x32xf32>
      %250 = arith.truncf %249 : vector<2x32xf32> to vector<2x32xbf16>
      %cst_85 = arith.constant dense<0.000000e+00> : vector<2x32xf32>
      %251 = tpu.matmul %250, %5, %cst_85 {dimension_numbers = #tpu.dot_dimension_numbers<[1], [0], [0], [1], [0, 0, 1, 1], [], []>} : vector<2x32xbf16>, vector<32x32xbf16>, vector<2x32xf32> -> vector<2x32xf32>
      %252 = arith.addf %251, %14 : vector<2x32xf32>
      %253 = vector.broadcast %104 : f32 to vector<2x32xf32>
      %254 = arith.mulf %253, %252 : vector<2x32xf32>
      %255 = arith.addf %227, %254 : vector<2x32xf32>
      %256 = arith.truncf %255 : vector<2x32xf32> to vector<2x32xbf16>
      %cst_86 = arith.constant dense<0.000000e+00> : vector<2x32xf32>
      %257 = tpu.matmul %256, %1, %cst_86 {dimension_numbers = #tpu.dot_dimension_numbers<[1], [0], [0], [1], [0, 0, 1, 1], [], []>} : vector<2x32xbf16>, vector<32x32xbf16>, vector<2x32xf32> -> vector<2x32xf32>
      %258 = arith.addf %257, %8 : vector<2x32xf32>
      %259 = math.tanh %258 : vector<2x32xf32>
      %260 = arith.truncf %259 : vector<2x32xf32> to vector<2x32xbf16>
      %cst_87 = arith.constant dense<0.000000e+00> : vector<2x32xf32>
      %261 = tpu.matmul %260, %3, %cst_87 {dimension_numbers = #tpu.dot_dimension_numbers<[1], [0], [0], [1], [0, 0, 1, 1], [], []>} : vector<2x32xbf16>, vector<32x32xbf16>, vector<2x32xf32> -> vector<2x32xf32>
      %262 = arith.addf %261, %11 : vector<2x32xf32>
      %263 = math.tanh %262 : vector<2x32xf32>
      %264 = arith.truncf %263 : vector<2x32xf32> to vector<2x32xbf16>
      %cst_88 = arith.constant dense<0.000000e+00> : vector<2x32xf32>
      %265 = tpu.matmul %264, %5, %cst_88 {dimension_numbers = #tpu.dot_dimension_numbers<[1], [0], [0], [1], [0, 0, 1, 1], [], []>} : vector<2x32xbf16>, vector<32x32xbf16>, vector<2x32xf32> -> vector<2x32xf32>
      %266 = arith.addf %265, %14 : vector<2x32xf32>
      %267 = vector.broadcast %103 : f32 to vector<2x32xf32>
      %268 = arith.mulf %267, %266 : vector<2x32xf32>
      %269 = arith.addf %227, %268 : vector<2x32xf32>
      %270 = arith.truncf %269 : vector<2x32xf32> to vector<2x32xbf16>
      %cst_89 = arith.constant dense<0.000000e+00> : vector<2x32xf32>
      %271 = tpu.matmul %270, %1, %cst_89 {dimension_numbers = #tpu.dot_dimension_numbers<[1], [0], [0], [1], [0, 0, 1, 1], [], []>} : vector<2x32xbf16>, vector<32x32xbf16>, vector<2x32xf32> -> vector<2x32xf32>
      %272 = arith.addf %271, %8 : vector<2x32xf32>
      %273 = math.tanh %272 : vector<2x32xf32>
      %274 = arith.truncf %273 : vector<2x32xf32> to vector<2x32xbf16>
      %cst_90 = arith.constant dense<0.000000e+00> : vector<2x32xf32>
      %275 = tpu.matmul %274, %3, %cst_90 {dimension_numbers = #tpu.dot_dimension_numbers<[1], [0], [0], [1], [0, 0, 1, 1], [], []>} : vector<2x32xbf16>, vector<32x32xbf16>, vector<2x32xf32> -> vector<2x32xf32>
      %276 = arith.addf %275, %11 : vector<2x32xf32>
      %277 = math.tanh %276 : vector<2x32xf32>
      %278 = arith.truncf %277 : vector<2x32xf32> to vector<2x32xbf16>
      %cst_91 = arith.constant dense<0.000000e+00> : vector<2x32xf32>
      %279 = tpu.matmul %278, %5, %cst_91 {dimension_numbers = #tpu.dot_dimension_numbers<[1], [0], [0], [1], [0, 0, 1, 1], [], []>} : vector<2x32xbf16>, vector<32x32xbf16>, vector<2x32xf32> -> vector<2x32xf32>
      %280 = arith.addf %279, %14 : vector<2x32xf32>
      %281 = arith.addf %252, %266 : vector<2x32xf32>
      %cst_92 = arith.constant 2.000000e+00 : f32
      %282 = vector.broadcast %cst_92 : f32 to vector<2x32xf32>
      %283 = arith.mulf %282, %281 : vector<2x32xf32>
      %284 = arith.addf %238, %283 : vector<2x32xf32>
      %285 = arith.addf %284, %280 : vector<2x32xf32>
      %286 = vector.broadcast %105 : f32 to vector<2x32xf32>
      %287 = arith.mulf %286, %285 : vector<2x32xf32>
      %288 = arith.addf %227, %287 : vector<2x32xf32>
      %c3_i32 = arith.constant 3 : i32
      %289 = arith.truncf %288 : vector<2x32xf32> to vector<2x32xbf16>
      %cst_93 = arith.constant dense<0.000000e+00> : vector<2x32xf32>
      %290 = tpu.matmul %289, %1, %cst_93 {dimension_numbers = #tpu.dot_dimension_numbers<[1], [0], [0], [1], [0, 0, 1, 1], [], []>} : vector<2x32xbf16>, vector<32x32xbf16>, vector<2x32xf32> -> vector<2x32xf32>
      %291 = arith.addf %290, %8 : vector<2x32xf32>
      %292 = math.tanh %291 : vector<2x32xf32>
      %293 = arith.truncf %292 : vector<2x32xf32> to vector<2x32xbf16>
      %cst_94 = arith.constant dense<0.000000e+00> : vector<2x32xf32>
      %294 = tpu.matmul %293, %3, %cst_94 {dimension_numbers = #tpu.dot_dimension_numbers<[1], [0], [0], [1], [0, 0, 1, 1], [], []>} : vector<2x32xbf16>, vector<32x32xbf16>, vector<2x32xf32> -> vector<2x32xf32>
      %295 = arith.addf %294, %11 : vector<2x32xf32>
      %296 = math.tanh %295 : vector<2x32xf32>
      %297 = arith.truncf %296 : vector<2x32xf32> to vector<2x32xbf16>
      %cst_95 = arith.constant dense<0.000000e+00> : vector<2x32xf32>
      %298 = tpu.matmul %297, %5, %cst_95 {dimension_numbers = #tpu.dot_dimension_numbers<[1], [0], [0], [1], [0, 0, 1, 1], [], []>} : vector<2x32xbf16>, vector<32x32xbf16>, vector<2x32xf32> -> vector<2x32xf32>
      %299 = arith.addf %298, %14 : vector<2x32xf32>
      %300 = vector.broadcast %104 : f32 to vector<2x32xf32>
      %301 = arith.mulf %300, %299 : vector<2x32xf32>
      %302 = arith.addf %288, %301 : vector<2x32xf32>
      %303 = arith.truncf %302 : vector<2x32xf32> to vector<2x32xbf16>
      %cst_96 = arith.constant dense<0.000000e+00> : vector<2x32xf32>
      %304 = tpu.matmul %303, %1, %cst_96 {dimension_numbers = #tpu.dot_dimension_numbers<[1], [0], [0], [1], [0, 0, 1, 1], [], []>} : vector<2x32xbf16>, vector<32x32xbf16>, vector<2x32xf32> -> vector<2x32xf32>
      %305 = arith.addf %304, %8 : vector<2x32xf32>
      %306 = math.tanh %305 : vector<2x32xf32>
      %307 = arith.truncf %306 : vector<2x32xf32> to vector<2x32xbf16>
      %cst_97 = arith.constant dense<0.000000e+00> : vector<2x32xf32>
      %308 = tpu.matmul %307, %3, %cst_97 {dimension_numbers = #tpu.dot_dimension_numbers<[1], [0], [0], [1], [0, 0, 1, 1], [], []>} : vector<2x32xbf16>, vector<32x32xbf16>, vector<2x32xf32> -> vector<2x32xf32>
      %309 = arith.addf %308, %11 : vector<2x32xf32>
      %310 = math.tanh %309 : vector<2x32xf32>
      %311 = arith.truncf %310 : vector<2x32xf32> to vector<2x32xbf16>
      %cst_98 = arith.constant dense<0.000000e+00> : vector<2x32xf32>
      %312 = tpu.matmul %311, %5, %cst_98 {dimension_numbers = #tpu.dot_dimension_numbers<[1], [0], [0], [1], [0, 0, 1, 1], [], []>} : vector<2x32xbf16>, vector<32x32xbf16>, vector<2x32xf32> -> vector<2x32xf32>
      %313 = arith.addf %312, %14 : vector<2x32xf32>
      %314 = vector.broadcast %104 : f32 to vector<2x32xf32>
      %315 = arith.mulf %314, %313 : vector<2x32xf32>
      %316 = arith.addf %288, %315 : vector<2x32xf32>
      %317 = arith.truncf %316 : vector<2x32xf32> to vector<2x32xbf16>
      %cst_99 = arith.constant dense<0.000000e+00> : vector<2x32xf32>
      %318 = tpu.matmul %317, %1, %cst_99 {dimension_numbers = #tpu.dot_dimension_numbers<[1], [0], [0], [1], [0, 0, 1, 1], [], []>} : vector<2x32xbf16>, vector<32x32xbf16>, vector<2x32xf32> -> vector<2x32xf32>
      %319 = arith.addf %318, %8 : vector<2x32xf32>
      %320 = math.tanh %319 : vector<2x32xf32>
      %321 = arith.truncf %320 : vector<2x32xf32> to vector<2x32xbf16>
      %cst_100 = arith.constant dense<0.000000e+00> : vector<2x32xf32>
      %322 = tpu.matmul %321, %3, %cst_100 {dimension_numbers = #tpu.dot_dimension_numbers<[1], [0], [0], [1], [0, 0, 1, 1], [], []>} : vector<2x32xbf16>, vector<32x32xbf16>, vector<2x32xf32> -> vector<2x32xf32>
      %323 = arith.addf %322, %11 : vector<2x32xf32>
      %324 = math.tanh %323 : vector<2x32xf32>
      %325 = arith.truncf %324 : vector<2x32xf32> to vector<2x32xbf16>
      %cst_101 = arith.constant dense<0.000000e+00> : vector<2x32xf32>
      %326 = tpu.matmul %325, %5, %cst_101 {dimension_numbers = #tpu.dot_dimension_numbers<[1], [0], [0], [1], [0, 0, 1, 1], [], []>} : vector<2x32xbf16>, vector<32x32xbf16>, vector<2x32xf32> -> vector<2x32xf32>
      %327 = arith.addf %326, %14 : vector<2x32xf32>
      %328 = vector.broadcast %103 : f32 to vector<2x32xf32>
      %329 = arith.mulf %328, %327 : vector<2x32xf32>
      %330 = arith.addf %288, %329 : vector<2x32xf32>
      %331 = arith.truncf %330 : vector<2x32xf32> to vector<2x32xbf16>
      %cst_102 = arith.constant dense<0.000000e+00> : vector<2x32xf32>
      %332 = tpu.matmul %331, %1, %cst_102 {dimension_numbers = #tpu.dot_dimension_numbers<[1], [0], [0], [1], [0, 0, 1, 1], [], []>} : vector<2x32xbf16>, vector<32x32xbf16>, vector<2x32xf32> -> vector<2x32xf32>
      %333 = arith.addf %332, %8 : vector<2x32xf32>
      %334 = math.tanh %333 : vector<2x32xf32>
      %335 = arith.truncf %334 : vector<2x32xf32> to vector<2x32xbf16>
      %cst_103 = arith.constant dense<0.000000e+00> : vector<2x32xf32>
      %336 = tpu.matmul %335, %3, %cst_103 {dimension_numbers = #tpu.dot_dimension_numbers<[1], [0], [0], [1], [0, 0, 1, 1], [], []>} : vector<2x32xbf16>, vector<32x32xbf16>, vector<2x32xf32> -> vector<2x32xf32>
      %337 = arith.addf %336, %11 : vector<2x32xf32>
      %338 = math.tanh %337 : vector<2x32xf32>
      %339 = arith.truncf %338 : vector<2x32xf32> to vector<2x32xbf16>
      %cst_104 = arith.constant dense<0.000000e+00> : vector<2x32xf32>
      %340 = tpu.matmul %339, %5, %cst_104 {dimension_numbers = #tpu.dot_dimension_numbers<[1], [0], [0], [1], [0, 0, 1, 1], [], []>} : vector<2x32xbf16>, vector<32x32xbf16>, vector<2x32xf32> -> vector<2x32xf32>
      %341 = arith.addf %340, %14 : vector<2x32xf32>
      %342 = arith.addf %313, %327 : vector<2x32xf32>
      %cst_105 = arith.constant 2.000000e+00 : f32
      %343 = vector.broadcast %cst_105 : f32 to vector<2x32xf32>
      %344 = arith.mulf %343, %342 : vector<2x32xf32>
      %345 = arith.addf %299, %344 : vector<2x32xf32>
      %346 = arith.addf %345, %341 : vector<2x32xf32>
      %347 = vector.broadcast %105 : f32 to vector<2x32xf32>
      %348 = arith.mulf %347, %346 : vector<2x32xf32>
      %349 = arith.addf %288, %348 : vector<2x32xf32>
      %c5_i32 = arith.constant 5 : i32
      %350 = arith.cmpi sge, %arg18, %c5_i32 : i32
      %351 = arith.extui %350 : i1 to i32
      %c0_i32_106 = arith.constant 0 : i32
      %352 = arith.cmpi ne, %351, %c0_i32_106 : i32
      scf.if %352 {
        %c5_i32_107 = arith.constant 5 : i32
        %353 = arith.subi %arg18, %c5_i32_107 : i32
        %354 = arith.index_cast %353 : i32 to index
        %c0_108 = arith.constant 0 : index
        %c0_109 = arith.constant 0 : index
        %355 = vector.load %arg17[%354, %c0_108, %c0_109] : memref<3x2x32xf32, #tpu.memory_space<vmem>>, vector<1x2x32xf32>
        %356 = vector.shape_cast %355 : vector<1x2x32xf32> to vector<2x32xf32>
        %357 = vector.shape_cast %349 : vector<2x32xf32> to vector<1x2x32xf32>
        tpu.vector_store %arg17[%354, %c0_108, %c0_109], %357 {strides = array<i32>} : memref<3x2x32xf32, #tpu.memory_space<vmem>>, vector<1x2x32xf32>,
      } else {
      }
      scf.yield %349 : vector<2x32xf32>
    }
    %c7_i32_18 = arith.constant 7 : i32
    %c0_19 = arith.constant 0 : index
    %c0_20 = arith.constant 0 : index
    %22 = vector.load %arg12[%c0_19, %c0_20] : memref<1x32xf32, #tpu.memory_space<vmem>>, vector<1x32xf32>
    %c0_21 = arith.constant 0 : index
    %c0_22 = arith.constant 0 : index
    %c0_23 = arith.constant 0 : index
    %23 = vector.load %arg17[%c0_21, %c0_22, %c0_23] : memref<3x2x32xf32, #tpu.memory_space<vmem>>, vector<3x2x32xf32>
    %24 = vector.extract_strided_slice %23 {offsets = [0, 0, 0], sizes = [1, 2, 32], strides = [1, 1, 1]} : vector<3x2x32xf32> to vector<1x2x32xf32>
    %25 = vector.shape_cast %24 : vector<1x2x32xf32> to vector<2x32xf32>
    %26 = vector.broadcast %22 : vector<1x32xf32> to vector<2x32xf32>
    %27 = arith.mulf %25, %26 : vector<2x32xf32>
    %cst = arith.constant dense<0.000000e+00> : vector<2xf32>
    %28 = vector.multi_reduction <add>, %27, %cst [1] : vector<2x32xf32> to vector<2xf32>
    %29 = vector.shape_cast %28 : vector<2xf32> to vector<2x1xf32>
    %30 = vector.extract_strided_slice %23 {offsets = [1, 0, 0], sizes = [1, 2, 32], strides = [1, 1, 1]} : vector<3x2x32xf32> to vector<1x2x32xf32>
    %31 = vector.shape_cast %30 : vector<1x2x32xf32> to vector<2x32xf32>
    %32 = vector.broadcast %22 : vector<1x32xf32> to vector<2x32xf32>
    %33 = arith.mulf %31, %32 : vector<2x32xf32>
    %cst_24 = arith.constant dense<0.000000e+00> : vector<2xf32>
    %34 = vector.multi_reduction <add>, %33, %cst_24 [1] : vector<2x32xf32> to vector<2xf32>
    %35 = vector.shape_cast %34 : vector<2xf32> to vector<2x1xf32>
    %36 = vector.extract_strided_slice %23 {offsets = [2, 0, 0], sizes = [1, 2, 32], strides = [1, 1, 1]} : vector<3x2x32xf32> to vector<1x2x32xf32>
    %37 = vector.shape_cast %36 : vector<1x2x32xf32> to vector<2x32xf32>
    %38 = vector.broadcast %22 : vector<1x32xf32> to vector<2x32xf32>
    %39 = arith.mulf %37, %38 : vector<2x32xf32>
    %cst_25 = arith.constant dense<0.000000e+00> : vector<2xf32>
    %40 = vector.multi_reduction <add>, %39, %cst_25 [1] : vector<2x32xf32> to vector<2xf32>
    %41 = vector.shape_cast %40 : vector<2xf32> to vector<2x1xf32>
    %42 = tpu.concatenate %29, %35, %41 in 1 : vector<2x1xf32>, vector<2x1xf32>, vector<2x1xf32> -> vector<2x3xf32>
    %c0_26 = arith.constant 0 : index
    %c0_27 = arith.constant 0 : index
    %43 = vector.load %arg13[%c0_26, %c0_27] : memref<1x1xf32, #tpu.memory_space<vmem>>, vector<1x1xf32>
    %44 = vector.broadcast %43 : vector<1x1xf32> to vector<2x3xf32>
    %45 = arith.addf %42, %44 : vector<2x3xf32>
    %c0_28 = arith.constant 0 : index
    %c0_29 = arith.constant 0 : index
    %46 = vector.load %arg14[%c0_28, %c0_29] : memref<2x3xf32, #tpu.memory_space<vmem>>, vector<2x3xf32>
    tpu.vector_store %arg14[%c0_28, %c0_29], %45 {strides = array<i32>} : memref<2x3xf32, #tpu.memory_space<vmem>>, vector<2x3xf32>,
    %c0_30 = arith.constant 0 : index
    %c0_31 = arith.constant 0 : index
    %47 = vector.load %arg5[%c0_30, %c0_31] : memref<2x3xf32, #tpu.memory_space<vmem>>, vector<2x3xf32>
    %48 = arith.subf %45, %47 : vector<2x3xf32>
    %49 = math.log %16 : vector<2x32xf32>
    %cst_32 = arith.constant 0.000000e+00 : f32
    %50 = vector.broadcast %cst_32 : f32 to vector<2x32xf32>
    %51 = arith.subf %50, %49 : vector<2x32xf32>
    %52 = arith.mulf %16, %16 : vector<2x32xf32>
    %53 = arith.mulf %15, %15 : vector<2x32xf32>
    %54 = arith.addf %52, %53 : vector<2x32xf32>
    %cst_33 = arith.constant 1.000000e+00 : f32
    %55 = vector.broadcast %cst_33 : f32 to vector<2x32xf32>
    %56 = arith.subf %54, %55 : vector<2x32xf32>
    %cst_34 = arith.constant 5.000000e-01 : f32
    %57 = vector.broadcast %cst_34 : f32 to vector<2x32xf32>
    %58 = arith.mulf %57, %56 : vector<2x32xf32>
    %59 = arith.addf %51, %58 : vector<2x32xf32>
    %cst_35 = arith.constant dense<0.000000e+00> : vector<2xf32>
    %60 = vector.multi_reduction <add>, %59, %cst_35 [1] : vector<2x32xf32> to vector<2xf32>
    %61 = vector.shape_cast %60 : vector<2xf32> to vector<2x1xf32>
    %cst_36 = arith.constant 3.200000e+01 : f32
    %62 = vector.broadcast %cst_36 : f32 to vector<2x1xf32>
    %63 = arith.divf %61, %62 : vector<2x1xf32>
    %cst_37 = arith.constant 0.00999999977 : f32
    %64 = vector.broadcast %cst_37 : f32 to vector<2x3xf32>
    %65 = arith.divf %48, %64 : vector<2x3xf32>
    %66 = arith.mulf %65, %65 : vector<2x3xf32>
    %cst_38 = arith.constant 5.000000e-01 : f32
    %67 = vector.broadcast %cst_38 : f32 to vector<2x3xf32>
    %68 = arith.mulf %67, %66 : vector<2x3xf32>
    %cst_39 = arith.constant 3.68623161 : f32
    %69 = vector.broadcast %cst_39 : f32 to vector<2x3xf32>
    %70 = arith.subf %69, %68 : vector<2x3xf32>
    %cst_40 = arith.constant dense<0.000000e+00> : vector<2xf32>
    %71 = vector.multi_reduction <add>, %70, %cst_40 [1] : vector<2x3xf32> to vector<2xf32>
    %72 = vector.shape_cast %71 : vector<2xf32> to vector<2x1xf32>
    %cst_41 = arith.constant 8.000000e+00 : f32
    %73 = vector.broadcast %cst_41 : f32 to vector<2x1xf32>
    %74 = arith.divf %72, %73 : vector<2x1xf32>
    %c0_42 = arith.constant 0 : index
    %75 = memref.load %arg1[%c0_42] : memref<1xf32, #tpu.memory_space<smem>>
    %76 = vector.broadcast %75 : f32 to vector<2x1xf32>
    %77 = arith.mulf %76, %63 : vector<2x1xf32>
    %78 = arith.subf %74, %77 : vector<2x1xf32>
    %79 = vector.shape_cast %78 : vector<2x1xf32> to vector<1x2x1xf32>
    %cst_43 = arith.constant dense<0xFF800000> : vector<1xf32>
    %80 = vector.multi_reduction <maximumf>, %79, %cst_43 [1, 2] : vector<1x2x1xf32> to vector<1xf32>
    %81 = vector.shape_cast %80 : vector<1xf32> to vector<1x1x1xf32>
    %82 = vector.extract %81[0, 0, 0] : f32 from vector<1x1x1xf32>
    %83 = vector.broadcast %82 : f32 to vector<2x1xf32>
    %84 = arith.subf %78, %83 : vector<2x1xf32>
    %85 = math.exp %84 : vector<2x1xf32>
    %86 = vector.shape_cast %85 : vector<2x1xf32> to vector<1x2x1xf32>
    %cst_44 = arith.constant dense<0.000000e+00> : vector<1xf32>
    %87 = vector.multi_reduction <add>, %86, %cst_44 [1, 2] : vector<1x2x1xf32> to vector<1xf32>
    %88 = vector.shape_cast %87 : vector<1xf32> to vector<1x1x1xf32>
    %89 = vector.extract %88[0, 0, 0] : f32 from vector<1x1x1xf32>
    %90 = math.log %89 : f32
    %91 = arith.addf %82, %90 : f32
    %cst_45 = arith.constant 0.000000e+00 : f32
    %92 = arith.subf %cst_45, %91 : f32
    %93 = arith.mulf %48, %48 : vector<2x3xf32>
    %94 = vector.shape_cast %93 : vector<2x3xf32> to vector<1x2x3xf32>
    %cst_46 = arith.constant dense<0.000000e+00> : vector<1xf32>
    %95 = vector.multi_reduction <add>, %94, %cst_46 [1, 2] : vector<1x2x3xf32> to vector<1xf32>
    %96 = vector.shape_cast %95 : vector<1xf32> to vector<1x1x1xf32>
    %97 = vector.extract %96[0, 0, 0] : f32 from vector<1x1x1xf32>
    %cst_47 = arith.constant 6.000000e+00 : f32
    %98 = arith.divf %97, %cst_47 : f32
    %c0_48 = arith.constant 0 : index
    %99 = memref.load %arg15[%c0_48] : memref<1xf32, #tpu.memory_space<smem>>
    memref.store %92, %arg15[%c0_48] : memref<1xf32, #tpu.memory_space<smem>>
    %c0_49 = arith.constant 0 : index
    %100 = memref.load %arg16[%c0_49] : memref<1xf32, #tpu.memory_space<smem>>
    memref.store %98, %arg16[%c0_49] : memref<1xf32, #tpu.memory_space<smem>>
    return
  }
}

</mosaic_0001>

<bundles_post_ra>
// kernel: tpu_custom_call.1
= control target key start
LH: loop header
LB: loop body
LE: loop exit
PB: predicated region body
PF: predicated region fallthrough
CT: control target
= control target key end

     0   :  { %s4279_s0 = inlined_call_operand.hbm [shape: f32[8], index: 0, kind: input, shape index: {}]   ;;  %s4280_s1 = inlined_call_operand.<no memory space> [shape: f32[1], index: 1, kind: input, shape index: {}]   ;;  %s4281_s2 = inlined_call_operand.vmem [shape: f32[2,32], index: 2, kind: input, shape index: {}]   ;;  %s4282_s3 = inlined_call_operand.hbm [shape: f32[2,32], index: 3, kind: input, shape index: {}]   ;;  %s4283_s4 = inlined_call_operand.hbm [shape: f32[2,32], index: 4, kind: input, shape index: {}]   ;;  %s4284_s5 = inlined_call_operand.hbm [shape: f32[2,3], index: 5, kind: input, shape index: {}]   ;;  %s4285_s6 = inlined_call_operand.hbm [shape: f32[32,32], index: 6, kind: input, shape index: {}]   ;;  %s4286_s7 = inlined_call_operand.hbm [shape: f32[1,32], index: 7, kind: input, shape index: {}]   ;;  %s4287_s8 = inlined_call_operand.vmem [shape: f32[32,32], index: 8, kind: input, shape index: {}]   ;;  %s4288_s9 = inlined_call_operand.vmem [shape: f32[1,32], index: 9, kind: input, shape index: {}]   ;;  %s4289_s10 = inlined_call_operand.hbm [shape: f32[32,32], index: 10, kind: input, shape index: {}]   ;;  %s4290_s11 = inlined_call_operand.vmem [shape: f32[1,32], index: 11, kind: input, shape index: {}]   ;;  %s4291_s12 = inlined_call_operand.vmem [shape: f32[1,32], index: 12, kind: input, shape index: {}]   ;;  %s4292_s13 = inlined_call_operand.<no memory space> [shape: f32[1,1], index: 13, kind: input, shape index: {}]   ;;  %s4293_s14 = inlined_call_operand.hbm [shape: f32[2,3], index: 14, kind: output, shape index: {0}]   ;;  %s4294_s15 = inlined_call_operand.hbm [shape: f32[1], index: 15, kind: output, shape index: {1}]   ;;  %s4295_s16 = inlined_call_operand.hbm [shape: f32[1], index: 16, kind: output, shape index: {2}]  }
   0x1   :  { %4297 = sst [smem:[#allocation31_spill]] %s4279_s0  ;;  %v23_v0 = vstv %s4292_s13 }
   0x2   :  { %22 = sst [smem:[#allocation3]] %s4280_s1  ;;  %24 = vst [vmem:[#allocation4] sm:$0x1] %v23_v0 }
   0x3   :  { %25 = vsyncpa [#allocation8], 0 }
   0x4   :  { %26 = vsyncpa [#allocation6], 0 }
   0x5   :  { %27 = vsyncpa [#allocation12], 0 }
   0x6   :  { %28 = vsyncpa [#allocation15], 0 }
   0x7   :  { %29 = vsyncpa [#allocation18], 0 }
   0x8   :  { %30 = vsyncpa [#allocation7], 0 }
   0x9   :  { %31 = vsyncpa [#allocation9], 0 }
   0xa   :  { %32 = vsyncpa [#allocation22], 0  ;;  %s3488_s25 = smov [#allocation11]   ;;  %s3489_s27 = smov [#allocation14]  }
   0xb   :  { %s61_s26 = sshll.u32 %s3488_s25, 4  ;;  %s80_s28 = sshll.u32 %s3489_s27, 4  ;;  %s62_s26 = int_to_ptr.vmem [resolvable:$true] %s61_s26  ;;  %s3594_s28 = int_to_ptr.vmem [resolvable:$true] %s80_s28 }
   0xc   :  { %s3272_s13 = scalar_lea.hbm %s4283_s4, 32 }
   0xd   :  { %p3273_p0 = scmp.ne.s32.totalorder %s4283_s4, %s3272_s13  ;;  %p3276_p1 = scmp.lt.u32.totalorder %s3272_s13, %s4283_s4 }
   0xf   :  { %p3278_p2 = pnand %p3276_p1, %p3273_p0 }
  0x11   :  { %3281 = shalt.err (!%p3278_p2)
}
  0x12   :  { %s3282_s19 = scalar_lea.vmem %s62_s26, 32  ;;  %p3287_p4 = scmp.lt.s32.totalorder %s62_s26, %s62_s26 }
  0x13   :  { %p3283_p3 = scmp.ne.s32.totalorder %s62_s26, %s3282_s19  ;;  %p3288_p5 = scmp.lt.s32.totalorder %s3282_s19, %s3282_s19 }
  0x15   :  { %p3289_p6 = por %p3288_p5, %p3287_p4 }
  0x17   :  { %p3290_p7 = pnand %p3289_p6, %p3283_p3 }
  0x19   :  { %3293 = shalt.err (!%p3290_p7)
}
  0x1a   :  { %64 = dma.hbm_to_vmem [thread:$0]  %s4283_s4, 32, %s62_s26, [#allocation12]  }
  0x1b   :  { %s3294_s24 = scalar_lea.hbm %s4285_s6, 512 }
  0x1c   :  { %p3295_p8 = scmp.ne.s32.totalorder %s4285_s6, %s3294_s24  ;;  %p3298_p9 = scmp.lt.u32.totalorder %s3294_s24, %s4285_s6 }
  0x1e   :  { %p3300_p10 = pnand %p3298_p9, %p3295_p8 }
  0x20   :  { %3303 = shalt.err (!%p3300_p10)
}
  0x21   :  { %s3304_s13 = scalar_lea.vmem %s3594_s28, 512  ;;  %p3309_p12 = scmp.lt.s32.totalorder %s3594_s28, %s3594_s28 }
  0x22   :  { %p3305_p11 = scmp.ne.s32.totalorder %s3594_s28, %s3304_s13  ;;  %p3310_p13 = scmp.lt.s32.totalorder %s3304_s13, %s3304_s13 }
  0x24   :  { %p3311_p0 = por %p3310_p13, %p3309_p12 }
  0x26   :  { %p3312_p1 = pnand %p3311_p0, %p3305_p11 }
  0x28   :  { %3315 = shalt.err (!%p3312_p1)
}
  0x29   :  { %s3490_s4 = smov 128   ;;  %s3491_s26 = smov 8  }
  0x2a   :  { %86 = dma.hbm_to_vmem [thread:$0]  %s4285_s6, 512, %s3594_s28, [#allocation15], %s3490_s4, %s3490_s4, %s3491_s26  }
  0x2b   :  { %s4298_s19 = sld [smem:[#allocation31_spill]] }
  0x31   :  { %s3316_s20 = scalar_lea.hbm %s4298_s19, 16 }
  0x32   :  { %p3317_p2 = scmp.ne.s32.totalorder %s4298_s19, %s3316_s20  ;;  %p3320_p3 = scmp.lt.u32.totalorder %s3316_s20, %s4298_s19 }
  0x34   :  { %p3322_p4 = pnand %p3320_p3, %p3317_p2 }
  0x36   :  { %3325 = shalt.err (!%p3322_p4)
}
  0x37   :  { %s3492_s25 = smov [#allocation5]   ;;  %s3493_s6 = smov [#allocation10]  }
  0x38   :  { %40 = dma.hbm_to_smem %s4298_s19, 16, %s3492_s25, [#allocation8]  }
  0x39   :  { %s51_s28 = sshll.u32 %s3493_s6, 4  ;;  %s3494_s29 = smov [#allocation13]   ;;  %s52_s28 = int_to_ptr.vmem [resolvable:$true] %s51_s28 }
  0x3a   :  { %s71_s13 = sshll.u32 %s3494_s29, 4  ;;  %s3326_s17 = scalar_lea.hbm %s4282_s3, 32  ;;  %s72_s13 = int_to_ptr.vmem [resolvable:$true] %s71_s13 }
  0x3b   :  { %p3327_p5 = scmp.ne.s32.totalorder %s4282_s3, %s3326_s17  ;;  %p3330_p6 = scmp.lt.u32.totalorder %s3326_s17, %s4282_s3 }
  0x3d   :  { %p3332_p7 = pnand %p3330_p6, %p3327_p5 }
  0x3f   :  { %3335 = shalt.err (!%p3332_p7)
}
  0x40   :  { %s3336_s19 = scalar_lea.vmem %s52_s28, 32  ;;  %p3341_p9 = scmp.lt.s32.totalorder %s52_s28, %s52_s28 }
  0x41   :  { %p3337_p8 = scmp.ne.s32.totalorder %s52_s28, %s3336_s19  ;;  %p3342_p10 = scmp.lt.s32.totalorder %s3336_s19, %s3336_s19 }
  0x43   :  { %p3343_p11 = por %p3342_p10, %p3341_p9 }
  0x45   :  { %p3344_p12 = pnand %p3343_p11, %p3337_p8 }
  0x47   :  { %3347 = shalt.err (!%p3344_p12)
}
  0x48   :  { %54 = dma.hbm_to_vmem [thread:$0]  %s4282_s3, 32, %s52_s28, [#allocation6]  }
  0x49   :  { %s3348_s1 = scalar_lea.hbm %s4284_s5, 32 }
  0x4a   :  { %p3349_p13 = scmp.ne.s32.totalorder %s4284_s5, %s3348_s1  ;;  %p3352_p0 = scmp.lt.u32.totalorder %s3348_s1, %s4284_s5 }
  0x4c   :  { %p3354_p1 = pnand %p3352_p0, %p3349_p13 }
  0x4e   :  { %3357 = shalt.err (!%p3354_p1)
}
  0x4f   :  { %s3358_s17 = scalar_lea.vmem %s72_s13, 32  ;;  %p3363_p3 = scmp.lt.s32.totalorder %s72_s13, %s72_s13 }
  0x50   :  { %p3359_p2 = scmp.ne.s32.totalorder %s72_s13, %s3358_s17  ;;  %p3364_p4 = scmp.lt.s32.totalorder %s3358_s17, %s3358_s17 }
  0x52   :  { %p3365_p5 = por %p3364_p4, %p3363_p3 }
  0x54   :  { %p3366_p6 = pnand %p3365_p5, %p3359_p2 }
  0x56   :  { %3369 = shalt.err (!%p3366_p6)
}
  0x57   :  { %74 = dma.hbm_to_vmem [thread:$0]  %s4284_s5, 32, %s72_s13, [#allocation12]  }
  0x58   :  { %s3495_s18 = smov [#allocation16]   ;;  %s3496_s20 = smov [#allocation17]  }
  0x59   :  { %s93_s21 = sshll.u32 %s3495_s18, 4  ;;  %s106_s22 = sshll.u32 %s3496_s20, 4  ;;  %s94_s21 = int_to_ptr.vmem [resolvable:$true] %s93_s21  ;;  %s107_s22 = int_to_ptr.vmem [resolvable:$true] %s106_s22 }
  0x5a   :  { %s3370_s24 = scalar_lea.hbm %s4286_s7, 16 }
  0x5b   :  { %p3371_p7 = scmp.ne.s32.totalorder %s4286_s7, %s3370_s24  ;;  %p3374_p8 = scmp.lt.u32.totalorder %s3370_s24, %s4286_s7 }
  0x5d   :  { %p3376_p9 = pnand %p3374_p8, %p3371_p7 }
  0x5f   :  { %3379 = shalt.err (!%p3376_p9)
}
  0x60   :  { %s3380_s5 = scalar_lea.vmem %s94_s21, 16  ;;  %s3384_s13 = scalar_lea.vmem %s94_s21, 32 }
  0x61   :  { %p3381_p10 = scmp.ne.s32.totalorder %s94_s21, %s3380_s5  ;;  %p3385_p11 = scmp.lt.s32.totalorder %s94_s21, %s94_s21 }
  0x62   :  { %p3386_p12 = scmp.lt.s32.totalorder %s3384_s13, %s3380_s5 }
  0x64   :  { %p3387_p13 = por %p3386_p12, %p3385_p11 }
  0x66   :  { %p3388_p0 = pnand %p3387_p13, %p3381_p10 }
  0x68   :  { %3391 = shalt.err (!%p3388_p0)
}
  0x69   :  { %96 = dma.hbm_to_vmem [thread:$0]  %s4286_s7, 16, %s94_s21, [#allocation15]  }
  0x6a   :  { %s3392_s3 = scalar_lea.hbm %s4289_s10, 512 }
  0x6b   :  { %p3393_p1 = scmp.ne.s32.totalorder %s4289_s10, %s3392_s3  ;;  %p3396_p2 = scmp.lt.u32.totalorder %s3392_s3, %s4289_s10 }
  0x6d   :  { %p3398_p3 = pnand %p3396_p2, %p3393_p1 }
  0x6f   :  { %3401 = shalt.err (!%p3398_p3)
}
  0x70   :  { %s3402_s23 = scalar_lea.vmem %s107_s22, 512  ;;  %p3407_p5 = scmp.lt.s32.totalorder %s107_s22, %s107_s22 }
  0x71   :  { %p3403_p4 = scmp.ne.s32.totalorder %s107_s22, %s3402_s23  ;;  %p3408_p6 = scmp.lt.s32.totalorder %s3402_s23, %s3402_s23 }
  0x73   :  { %p3409_p7 = por %p3408_p6, %p3407_p5 }
  0x75   :  { %p3410_p8 = pnand %p3409_p7, %p3403_p4 }
  0x77   :  { %3413 = shalt.err (!%p3410_p8)
}
  0x78   :  { %112 = dma.hbm_to_vmem [thread:$0]  %s4289_s10, 512, %s107_s22, [#allocation18], %s3490_s4, %s3490_s4, %s3491_s26  }
  0x79   :  { %3464 = dma.done.wait [#allocation8], 16  }
  0x7a   :  { %3465 = vsyncadd [#allocation8], 4294967280 }
  0x7b   :  { %3466 = dma.done.wait [#allocation6], 32  }
  0x7c   :  { %3467 = vsyncadd [#allocation6], 4294967264 }
  0x7d   :  { %3468 = dma.done.wait [#allocation12], 64  }
  0x7e   :  { %3469 = vsyncadd [#allocation12], 4294967232 }
  0x7f   :  { %3470 = dma.done.wait [#allocation15], 528  }
  0x80   :  { %3471 = vsyncadd [#allocation15], 4294966768 }
  0x81   :  { %3472 = dma.done.wait [#allocation18], 512  }
  0x82   :  { %3473 = vsyncadd [#allocation18], 4294966784 }
  0x83   :  { %140 = sfence }
  0x84   :  { %v142_v1 = vld [vmem:[#allocation14] sm:$0xff]  ;;  %v143_v2 = vld [vmem:[#allocation14 + $0x8] sm:$0xff]  ;;  %v144_v3 = vld [vmem:[#allocation14 + $0x10] sm:$0xff] }
  0x85   :  { %v145_v4 = vld [vmem:[#allocation14 + $0x18] sm:$0xff]  ;;  %v3691_v5 = vpack.c.bf16 %v143_v2, %v142_v1  ;;  %v150_v9 = vld [vmem:[%s4287_s8 + $0x10] sm:$0xff]  ;;  %v151_v10 = vld [vmem:[%s4287_s8 + $0x18] sm:$0xff] }
  0x86   :  { %v148_v6 = vld [vmem:[%s4287_s8] sm:$0xff]  ;;  %v149_v7 = vld [vmem:[%s4287_s8 + $0x8] sm:$0xff]  ;;  %v3699_v8 = vpack.c.bf16 %v145_v4, %v144_v3  ;;  %v3709_v13 = vpack.c.bf16 %v151_v10, %v150_v9  ;;  %v155_v14 = vld [vmem:[#allocation17 + $0x8] sm:$0xff] }
  0x87   :  { %v3707_v11 = vpack.c.bf16 %v149_v7, %v148_v6  ;;  %v154_v12 = vld [vmem:[#allocation17] sm:$0xff]  ;;  %v156_v15 = vld [vmem:[#allocation17 + $0x10] sm:$0xff]  ;;  %v157_v16 = vld [vmem:[#allocation17 + $0x18] sm:$0xff] }
  0x88   :  { %v3711_v17 = vpack.c.bf16 %v155_v14, %v154_v12  ;;  %v3713_v18 = vpack.c.bf16 %v157_v16, %v156_v15  ;;  %v3715_v19 = vld [vmem:[#allocation16] ss:$0 sm:$0xff]  ;;  %v3720_v20 = vld [vmem:[%s4288_s9] ss:$0 sm:$0xff]  ;;  %v3732_v23 = vld [vmem:[#allocation10] sm:$0x3] }
  0x89   :  { %v3725_v21 = vld [vmem:[%s4290_s11] ss:$0 sm:$0xff]  ;;  %v183_v24 = vld [vmem:[#allocation11] sm:$0x3]  ;;  %s3738_s9 = smov 1  }
  0x8a   :  { %v3730_v22 = vld [vmem:[%s4281_s2] sm:$0x3]  ;;  %v184_v25 = vmul.f32 %v183_v24, %v3732_v23 }
  0x8c   :  { %v185_v26 = vadd.f32 %v184_v25, %v3730_v22  }
  0x8d LB: > { %v3497_v27 = vmov 0.0   ;;  %vm3498_vm0 = vmmov 0   ;;  %v199_v28 = vpack.c.bf16 %v3482_v26, %v3482_v26  ;;  %vm200_vm1 = vcmask 261120   ;;  %s193_s2 = sld [smem:[#allocation5 + %s3486_s9]]  ;;  %p2627_p9 = scmp.lt.s32.totalorder %s3486_s9, 5  ;;  %s3486_s9 = sphi %s3738_s9, %s191_s9   ;;  %v3482_v26 = vphi %v185_v26, %v2394_v26  }
  0x8e   : > { %2777 = vmatprep.subr.bf16.mxu0 %v3497_v27  ;;  %2781 = vmatprep.mubr.msk.bf16.mxu0 %vm3498_vm0, %v3497_v27  ;;  %s2628_s3 = sadd.s32 (!%p2627_p9), 4294967291, %s3486_s9  ;;  %vm2402_vm2 = vcmask (!%p2627_p9), 254976  }
  0x8f   : > { %2778 = vmatpush3.bf16.msra.mxu0 %v3691_v5  ;;  %2785 = vmatprep.subr.bf16.mxu1 %v3497_v27  ;;  %s2629_s28 = sshll.u32 (!%p2627_p9), %s2628_s3, 1 }
  0x90   : > { %2779 = vmatprep.subr.bf16.mxu0 %v3497_v27  ;;  %2786 = vmatpush3.bf16.msra.mxu1 %v3707_v11  ;;  %s2401_s18 = scalar_lea.vmem (!%p2627_p9), [#allocation2], %s2629_s28 }
  0x91   : > { %2787 = vmatprep.subr.bf16.mxu1 %v3497_v27  ;;  %2789 = vmatprep.mubr.msk.bf16.mxu1 %vm3498_vm0, %v3497_v27 }
  0x93   : > { %2780 = vmatpush3.bf16.msra.mxu0 %v3699_v8  ;;  %s3786_s11 = smul.f32 0.25, %s193_s2 }
  0x94   : > { %2788 = vmatpush3.bf16.msra.mxu1 %v3709_v13  ;;  %2793 = vmatprep.subr.bf16.mxu0 %v3497_v27 }
  0x95   : > { %2801 = vmatprep.subr.bf16.mxu1 %v3497_v27  ;;  %s197_s0 = smul.f32 0.5, %s3786_s11 }
  0x96   : > { %2782 = vmatmul.mubr.msk.bf16.vlgmr.msra.gmra.mrb[0].mxu0 %vm200_vm1, %v199_v28  ;;  %s198_s17 = smul.f32 0.16666667, %s3786_s11 }
  0x97   : > { %2794 = vmatpush3.bf16.msra.mxu0 %v3711_v17  ;;  %2797 = vmatprep.mubr.msk.bf16.mxu0 %vm3498_vm0, %v3497_v27  ;;  %v3789_v44 = vstv %s197_s0 }
  0x98   : > { %2795 = vmatprep.subr.bf16.mxu0 %v3497_v27 }
  0x9b   : > { %2796 = vmatpush3.bf16.msra.mxu0 %v3713_v18 }
  0x9c   : > { %2809 = vmatprep.subr.bf16.mxu0 %v3497_v27 }
 0x169   : > { %v238_v29 = vpop.f32.mrb[0].mxu0 }
 0x16a   : > { %v239_v30 = vadd.f32 %v3715_v19, %v238_v29  ;;  %v2783_v31 = vpop.f32.mrb[1].mxu0 }
 0x16b   : > { %v241_v32 = vpop.f32.mrb[2].mxu0 }
 0x16c   : > { %3200 = vtanh.f32 %v239_v30  ;;  %v2784_v33 = vpop.f32.mrb[3].mxu0 }
 0x176   : > { %v3201_v34 = vpop.eup %3200 }
 0x177   : > { %v245_v35 = vpack.c.bf16 %v3201_v34, %v3201_v34 }
 0x179   : > { %2790 = vmatmul.mubr.msk.bf16.vlgmr.msra.gmra.mrb[0].mxu1 %vm200_vm1, %v245_v35 }
 0x17a   : > { %2802 = vmatpush3.bf16.msra.mxu1 %v3691_v5  ;;  %2805 = vmatprep.mubr.msk.bf16.mxu1 %vm3498_vm0, %v3497_v27 }
 0x17b   : > { %2803 = vmatprep.subr.bf16.mxu1 %v3497_v27 }
 0x17e   : > { %2804 = vmatpush3.bf16.msra.mxu1 %v3699_v8 }
 0x17f   : > { %2817 = vmatprep.subr.bf16.mxu1 %v3497_v27 }
 0x24c   : > { %v283_v36 = vpop.f32.mrb[0].mxu1 }
 0x24d   : > { %v284_v37 = vadd.f32 %v3720_v20, %v283_v36  ;;  %v2791_v38 = vpop.f32.mrb[1].mxu1 }
 0x24e   : > { %v286_v39 = vpop.f32.mrb[2].mxu1  ;;  %v3850_v38 = vstv %s3786_s11 }
 0x24f   : > { %3202 = vtanh.f32 %v284_v37  ;;  %v2792_v40 = vpop.f32.mrb[3].mxu1 }
 0x259   : > { %v3203_v41 = vpop.eup %3202 }
 0x25a   : > { %v290_v42 = vpack.c.bf16 %v3203_v41, %v3203_v41 }
 0x25c   : > { %2798 = vmatmul.mubr.msk.bf16.vlgmr.msra.gmra.mrb[4].mxu0 %vm200_vm1, %v290_v42 }
 0x25d   : > { %2810 = vmatpush3.bf16.msra.mxu0 %v3707_v11  ;;  %2813 = vmatprep.mubr.msk.bf16.mxu0 %vm3498_vm0, %v3497_v27 }
 0x25e   : > { %2811 = vmatprep.subr.bf16.mxu0 %v3497_v27 }
 0x261   : > { %2812 = vmatpush3.bf16.msra.mxu0 %v3709_v13 }
 0x262   : > { %2825 = vmatprep.subr.bf16.mxu0 %v3497_v27 }
 0x32f   : > { %v328_v43 = vpop.f32.mrb[4].mxu0 }
 0x330   : > { %v3792_v45 = vadd.f32 %v3725_v21, %v328_v43  ;;  %v2799_v46 = vpop.f32.mrb[5].mxu0 }
 0x331   : > { %v331_v47 = vpop.f32.mrb[6].mxu0 }
 0x332   : > { %v335_v48 = vmul.f32 %v3789_v44, %v3792_v45  ;;  %v2800_v49 = vpop.f32.mrb[7].mxu0 }
 0x334   : > { %v336_v50 = vadd.f32 %v3482_v26, %v335_v48 }
 0x336   : > { %v337_v51 = vpack.c.bf16 %v336_v50, %v336_v50 }
 0x338   : > { %2806 = vmatmul.mubr.msk.bf16.vlgmr.msra.gmra.mrb[4].mxu1 %vm200_vm1, %v337_v51 }
 0x339   : > { %2818 = vmatpush3.bf16.msra.mxu1 %v3711_v17  ;;  %2821 = vmatprep.mubr.msk.bf16.mxu1 %vm3498_vm0, %v3497_v27 }
 0x33a   : > { %2819 = vmatprep.subr.bf16.mxu1 %v3497_v27 }
 0x33d   : > { %2820 = vmatpush3.bf16.msra.mxu1 %v3713_v18 }
 0x33e   : > { %2833 = vmatprep.subr.bf16.mxu1 %v3497_v27 }
 0x40b   : > { %v375_v52 = vpop.f32.mrb[4].mxu1 }
 0x40c   : > { %v376_v53 = vadd.f32 %v3715_v19, %v375_v52  ;;  %v2807_v54 = vpop.f32.mrb[5].mxu1 }
 0x40d   : > { %v378_v55 = vpop.f32.mrb[6].mxu1 }
 0x40e   : > { %3204 = vtanh.f32 %v376_v53  ;;  %v2808_v56 = vpop.f32.mrb[7].mxu1 }
 0x418   : > { %v3205_v57 = vpop.eup %3204 }
 0x419   : > { %v382_v58 = vpack.c.bf16 %v3205_v57, %v3205_v57 }
 0x41b   : > { %2814 = vmatmul.mubr.msk.bf16.vlgmr.msra.gmra.mrb[8].mxu0 %vm200_vm1, %v382_v58 }
 0x41c   : > { %2826 = vmatpush3.bf16.msra.mxu0 %v3691_v5  ;;  %2829 = vmatprep.mubr.msk.bf16.mxu0 %vm3498_vm0, %v3497_v27 }
 0x41d   : > { %2827 = vmatprep.subr.bf16.mxu0 %v3497_v27 }
 0x420   : > { %2828 = vmatpush3.bf16.msra.mxu0 %v3699_v8 }
 0x421   : > { %2841 = vmatprep.subr.bf16.mxu0 %v3497_v27 }
 0x4ee   : > { %v420_v59 = vpop.f32.mrb[8].mxu0 }
 0x4ef   : > { %v421_v60 = vadd.f32 %v3720_v20, %v420_v59  ;;  %v2815_v61 = vpop.f32.mrb[9].mxu0 }
 0x4f0   : > { %v423_v62 = vpop.f32.mrb[10].mxu0 }
 0x4f1   : > { %3206 = vtanh.f32 %v421_v60  ;;  %v2816_v63 = vpop.f32.mrb[11].mxu0 }
 0x4fb   : > { %v3207_v0 = vpop.eup %3206 }
 0x4fc   : > { %v427_v1 = vpack.c.bf16 %v3207_v0, %v3207_v0 }
 0x4fe   : > { %2822 = vmatmul.mubr.msk.bf16.vlgmr.msra.gmra.mrb[8].mxu1 %vm200_vm1, %v427_v1 }
 0x4ff   : > { %2834 = vmatpush3.bf16.msra.mxu1 %v3707_v11  ;;  %2837 = vmatprep.mubr.msk.bf16.mxu1 %vm3498_vm0, %v3497_v27 }
 0x500   : > { %2835 = vmatprep.subr.bf16.mxu1 %v3497_v27 }
 0x503   : > { %2836 = vmatpush3.bf16.msra.mxu1 %v3709_v13 }
 0x504   : > { %2849 = vmatprep.subr.bf16.mxu1 %v3497_v27 }
 0x5d1   : > { %v465_v2 = vpop.f32.mrb[8].mxu1 }
 0x5d2   : > { %v3821_v3 = vadd.f32 %v3725_v21, %v465_v2  ;;  %v2823_v4 = vpop.f32.mrb[9].mxu1 }
 0x5d3   : > { %v468_v6 = vpop.f32.mrb[10].mxu1 }
 0x5d4   : > { %v471_v7 = vmul.f32 %v3821_v3, %v3789_v44  ;;  %v2824_v9 = vpop.f32.mrb[11].mxu1  ;;  %v3882_v6 = vstv %s198_s17 }
 0x5d6   : > { %v472_v10 = vadd.f32 %v3482_v26, %v471_v7 }
 0x5d8   : > { %v473_v12 = vpack.c.bf16 %v472_v10, %v472_v10 }
 0x5da   : > { %2830 = vmatmul.mubr.msk.bf16.vlgmr.msra.gmra.mrb[12].mxu0 %vm200_vm1, %v473_v12 }
 0x5db   : > { %2842 = vmatpush3.bf16.msra.mxu0 %v3711_v17  ;;  %2845 = vmatprep.mubr.msk.bf16.mxu0 %vm3498_vm0, %v3497_v27 }
 0x5dc   : > { %2843 = vmatprep.subr.bf16.mxu0 %v3497_v27 }
 0x5df   : > { %2844 = vmatpush3.bf16.msra.mxu0 %v3713_v18 }
 0x5e0   : > { %2857 = vmatprep.subr.bf16.mxu0 %v3497_v27 }
 0x6ad   : > { %v511_v14 = vpop.f32.mrb[12].mxu0 }
 0x6ae   : > { %v512_v15 = vadd.f32 %v3715_v19, %v511_v14  ;;  %v2831_v16 = vpop.f32.mrb[13].mxu0 }
 0x6af   : > { %v514_v24 = vpop.f32.mrb[14].mxu0 }
 0x6b0   : > { %3208 = vtanh.f32 %v512_v15  ;;  %v2832_v25 = vpop.f32.mrb[15].mxu0 }
 0x6ba   : > { %v3209_v28 = vpop.eup %3208 }
 0x6bb   : > { %v518_v29 = vpack.c.bf16 %v3209_v28, %v3209_v28 }
 0x6bd   : > { %2838 = vmatmul.mubr.msk.bf16.vlgmr.msra.gmra.mrb[12].mxu1 %vm200_vm1, %v518_v29 }
 0x6be   : > { %2850 = vmatpush3.bf16.msra.mxu1 %v3691_v5  ;;  %2853 = vmatprep.mubr.msk.bf16.mxu1 %vm3498_vm0, %v3497_v27 }
 0x6bf   : > { %2851 = vmatprep.subr.bf16.mxu1 %v3497_v27 }
 0x6c2   : > { %2852 = vmatpush3.bf16.msra.mxu1 %v3699_v8 }
 0x6c3   : > { %2865 = vmatprep.subr.bf16.mxu1 %v3497_v27 }
 0x790   : > { %v556_v30 = vpop.f32.mrb[12].mxu1 }
 0x791   : > { %v557_v31 = vadd.f32 %v3720_v20, %v556_v30  ;;  %v2839_v32 = vpop.f32.mrb[13].mxu1 }
 0x792   : > { %v559_v33 = vpop.f32.mrb[14].mxu1 }
 0x793   : > { %3210 = vtanh.f32 %v557_v31  ;;  %v2840_v34 = vpop.f32.mrb[15].mxu1 }
 0x79d   : > { %v3211_v35 = vpop.eup %3210 }
 0x79e   : > { %v563_v36 = vpack.c.bf16 %v3211_v35, %v3211_v35 }
 0x7a0   : > { %2846 = vmatmul.mubr.msk.bf16.vlgmr.msra.gmra.mrb[16].mxu0 %vm200_vm1, %v563_v36 }
 0x7a1   : > { %2858 = vmatpush3.bf16.msra.mxu0 %v3707_v11  ;;  %2861 = vmatprep.mubr.msk.bf16.mxu0 %vm3498_vm0, %v3497_v27 }
 0x7a2   : > { %2859 = vmatprep.subr.bf16.mxu0 %v3497_v27 }
 0x7a5   : > { %2860 = vmatpush3.bf16.msra.mxu0 %v3709_v13 }
 0x7a6   : > { %2873 = vmatprep.subr.bf16.mxu0 %v3497_v27 }
 0x873   : > { %v601_v37 = vpop.f32.mrb[16].mxu0 }
 0x874   : > { %v602_v39 = vadd.f32 %v3725_v21, %v601_v37  ;;  %v2847_v40 = vpop.f32.mrb[17].mxu0 }
 0x875   : > { %v604_v41 = vpop.f32.mrb[18].mxu0 }
 0x876   : > { %v608_v42 = vmul.f32 %v3850_v38, %v602_v39  ;;  %v2848_v43 = vpop.f32.mrb[19].mxu0  ;;  %v744_v62 = vadd.f32 %v602_v39, %v3821_v3 }
 0x878   : > { %v609_v46 = vadd.f32 %v3482_v26, %v608_v42  ;;  %v745_v63 = vmul.f32 2.0, %v744_v62 }
 0x87a   : > { %v610_v47 = vpack.c.bf16 %v609_v46, %v609_v46  ;;  %v746_v2 = vadd.f32 %v745_v63, %v3792_v45 }
 0x87c   : > { %2854 = vmatmul.mubr.msk.bf16.vlgmr.msra.gmra.mrb[16].mxu1 %vm200_vm1, %v610_v47 }
 0x87d   : > { %2866 = vmatpush3.bf16.msra.mxu1 %v3711_v17  ;;  %2869 = vmatprep.mubr.msk.bf16.mxu1 %vm3498_vm0, %v3497_v27 }
 0x87e   : > { %2867 = vmatprep.subr.bf16.mxu1 %v3497_v27 }
 0x881   : > { %2868 = vmatpush3.bf16.msra.mxu1 %v3713_v18 }
 0x882   : > { %2881 = vmatprep.subr.bf16.mxu1 %v3497_v27 }
 0x94f   : > { %v648_v48 = vpop.f32.mrb[16].mxu1 }
 0x950   : > { %v649_v49 = vadd.f32 %v3715_v19, %v648_v48  ;;  %v2855_v50 = vpop.f32.mrb[17].mxu1 }
 0x951   : > { %v651_v51 = vpop.f32.mrb[18].mxu1 }
 0x952   : > { %3212 = vtanh.f32 %v649_v49  ;;  %v2856_v52 = vpop.f32.mrb[19].mxu1 }
 0x95c   : > { %v3213_v53 = vpop.eup %3212 }
 0x95d   : > { %v655_v54 = vpack.c.bf16 %v3213_v53, %v3213_v53 }
 0x95f   : > { %2862 = vmatmul.mubr.msk.bf16.vlgmr.msra.gmra.mrb[20].mxu0 %vm200_vm1, %v655_v54 }
 0x960   : > { %2874 = vmatpush3.bf16.msra.mxu0 %v3691_v5  ;;  %2877 = vmatprep.mubr.msk.bf16.mxu0 %vm3498_vm0, %v3497_v27 }
 0x961   : > { %2875 = vmatprep.subr.bf16.mxu0 %v3497_v27 }
 0x964   : > { %2876 = vmatpush3.bf16.msra.mxu0 %v3699_v8 }
 0x965   : > { %2889 = vmatprep.subr.bf16.mxu0 %v3497_v27 }
 0xa32   : > { %v693_v55 = vpop.f32.mrb[20].mxu0 }
 0xa33   : > { %v694_v56 = vadd.f32 %v3720_v20, %v693_v55  ;;  %v2863_v57 = vpop.f32.mrb[21].mxu0 }
 0xa34   : > { %v696_v58 = vpop.f32.mrb[22].mxu0 }
 0xa35   : > { %3214 = vtanh.f32 %v694_v56  ;;  %v2864_v59 = vpop.f32.mrb[23].mxu0 }
 0xa3f   : > { %v3215_v60 = vpop.eup %3214 }
 0xa40   : > { %v700_v61 = vpack.c.bf16 %v3215_v60, %v3215_v60 }
 0xa42   : > { %2870 = vmatmul.mubr.msk.bf16.vlgmr.msra.gmra.mrb[20].mxu1 %vm200_vm1, %v700_v61 }
 0xa43   : > { %2882 = vmatpush3.bf16.msra.mxu1 %v3707_v11  ;;  %2885 = vmatprep.mubr.msk.bf16.mxu1 %vm3498_vm0, %v3497_v27 }
 0xa44   : > { %2883 = vmatprep.subr.bf16.mxu1 %v3497_v27 }
 0xa47   : > { %2884 = vmatpush3.bf16.msra.mxu1 %v3709_v13 }
 0xa48   : > { %2897 = vmatprep.subr.bf16.mxu1 %v3497_v27 }
 0xb15   : > { %v738_v0 = vpop.f32.mrb[20].mxu1 }
 0xb16   : > { %v739_v1 = vadd.f32 %v3725_v21, %v738_v0  ;;  %v2871_v4 = vpop.f32.mrb[21].mxu1 }
 0xb17   : > { %v741_v7 = vpop.f32.mrb[22].mxu1 }
 0xb18   : > { %v747_v9 = vadd.f32 %v746_v2, %v739_v1  ;;  %v2872_v10 = vpop.f32.mrb[23].mxu1 }
 0xb1a   : > { %v749_v12 = vmul.f32 %v3882_v6, %v747_v9 }
 0xb1c   : > { %v3886_v14 = vadd.f32 %v3482_v26, %v749_v12 }
 0xb1e   : > { %v751_v3 = vpack.c.bf16 %v3886_v14, %v3886_v14 }
 0xb20   : > { %2878 = vmatmul.mubr.msk.bf16.vlgmr.msra.gmra.mrb[24].mxu0 %vm200_vm1, %v751_v3 }
 0xb21   : > { %2890 = vmatpush3.bf16.msra.mxu0 %v3711_v17  ;;  %2893 = vmatprep.mubr.msk.bf16.mxu0 %vm3498_vm0, %v3497_v27 }
 0xb22   : > { %2891 = vmatprep.subr.bf16.mxu0 %v3497_v27 }
 0xb25   : > { %2892 = vmatpush3.bf16.msra.mxu0 %v3713_v18 }
 0xb26   : > { %2905 = vmatprep.subr.bf16.mxu0 %v3497_v27 }
 0xbf3   : > { %v789_v45 = vpop.f32.mrb[24].mxu0 }
 0xbf4   : > { %v790_v26 = vadd.f32 %v3715_v19, %v789_v45  ;;  %v2879_v15 = vpop.f32.mrb[25].mxu0 }
 0xbf5   : > { %v792_v16 = vpop.f32.mrb[26].mxu0 }
 0xbf6   : > { %3216 = vtanh.f32 %v790_v26  ;;  %v2880_v24 = vpop.f32.mrb[27].mxu0 }
 0xc00   : > { %v3217_v25 = vpop.eup %3216 }
 0xc01   : > { %v796_v28 = vpack.c.bf16 %v3217_v25, %v3217_v25 }
 0xc03   : > { %2886 = vmatmul.mubr.msk.bf16.vlgmr.msra.gmra.mrb[24].mxu1 %vm200_vm1, %v796_v28 }
 0xc04   : > { %2898 = vmatpush3.bf16.msra.mxu1 %v3691_v5  ;;  %2901 = vmatprep.mubr.msk.bf16.mxu1 %vm3498_vm0, %v3497_v27 }
 0xc05   : > { %2899 = vmatprep.subr.bf16.mxu1 %v3497_v27 }
 0xc08   : > { %2900 = vmatpush3.bf16.msra.mxu1 %v3699_v8 }
 0xc09   : > { %2913 = vmatprep.subr.bf16.mxu1 %v3497_v27 }
 0xcd6   : > { %v834_v29 = vpop.f32.mrb[24].mxu1 }
 0xcd7   : > { %v835_v30 = vadd.f32 %v3720_v20, %v834_v29  ;;  %v2887_v31 = vpop.f32.mrb[25].mxu1 }
 0xcd8   : > { %v837_v32 = vpop.f32.mrb[26].mxu1 }
 0xcd9   : > { %3218 = vtanh.f32 %v835_v30  ;;  %v2888_v33 = vpop.f32.mrb[27].mxu1 }
 0xce3   : > { %v3219_v34 = vpop.eup %3218 }
 0xce4   : > { %v841_v35 = vpack.c.bf16 %v3219_v34, %v3219_v34 }
 0xce6   : > { %2894 = vmatmul.mubr.msk.bf16.vlgmr.msra.gmra.mrb[28].mxu0 %vm200_vm1, %v841_v35 }
 0xce7   : > { %2906 = vmatpush3.bf16.msra.mxu0 %v3707_v11  ;;  %2909 = vmatprep.mubr.msk.bf16.mxu0 %vm3498_vm0, %v3497_v27 }
 0xce8   : > { %2907 = vmatprep.subr.bf16.mxu0 %v3497_v27 }
 0xceb   : > { %2908 = vmatpush3.bf16.msra.mxu0 %v3709_v13 }
 0xcec   : > { %2921 = vmatprep.subr.bf16.mxu0 %v3497_v27 }
 0xdb9   : > { %v879_v36 = vpop.f32.mrb[28].mxu0 }
 0xdba   : > { %v3914_v37 = vadd.f32 %v3725_v21, %v879_v36  ;;  %v2895_v39 = vpop.f32.mrb[29].mxu0 }
 0xdbb   : > { %v882_v40 = vpop.f32.mrb[30].mxu0 }
 0xdbc   : > { %v885_v41 = vmul.f32 %v3914_v37, %v3789_v44  ;;  %v2896_v42 = vpop.f32.mrb[31].mxu0 }
 0xdbe   : > { %v886_v43 = vadd.f32 %v885_v41, %v3886_v14 }
 0xdc0   : > { %v887_v46 = vpack.c.bf16 %v886_v43, %v886_v43 }
 0xdc2   : > { %2902 = vmatmul.mubr.msk.bf16.vlgmr.msra.gmra.mrb[28].mxu1 %vm200_vm1, %v887_v46 }
 0xdc3   : > { %2914 = vmatpush3.bf16.msra.mxu1 %v3711_v17  ;;  %2917 = vmatprep.mubr.msk.bf16.mxu1 %vm3498_vm0, %v3497_v27 }
 0xdc4   : > { %2915 = vmatprep.subr.bf16.mxu1 %v3497_v27 }
 0xdc7   : > { %2916 = vmatpush3.bf16.msra.mxu1 %v3713_v18 }
 0xdc8   : > { %2929 = vmatprep.subr.bf16.mxu1 %v3497_v27 }
 0xe95   : > { %v925_v47 = vpop.f32.mrb[28].mxu1 }
 0xe96   : > { %v926_v48 = vadd.f32 %v3715_v19, %v925_v47  ;;  %v2903_v49 = vpop.f32.mrb[29].mxu1 }
 0xe97   : > { %v928_v50 = vpop.f32.mrb[30].mxu1 }
 0xe98   : > { %3220 = vtanh.f32 %v926_v48  ;;  %v2904_v51 = vpop.f32.mrb[31].mxu1 }
 0xea2   : > { %v3221_v52 = vpop.eup %3220 }
 0xea3   : > { %v932_v53 = vpack.c.bf16 %v3221_v52, %v3221_v52 }
 0xea5   : > { %2910 = vmatmul.mubr.msk.bf16.vlgmr.msra.gmra.mrb[32].mxu0 %vm200_vm1, %v932_v53 }
 0xea6   : > { %2922 = vmatpush3.bf16.msra.mxu0 %v3691_v5  ;;  %2925 = vmatprep.mubr.msk.bf16.mxu0 %vm3498_vm0, %v3497_v27 }
 0xea7   : > { %2923 = vmatprep.subr.bf16.mxu0 %v3497_v27 }
 0xeaa   : > { %2924 = vmatpush3.bf16.msra.mxu0 %v3699_v8 }
 0xeab   : > { %2937 = vmatprep.subr.bf16.mxu0 %v3497_v27 }
 0xf78   : > { %v970_v54 = vpop.f32.mrb[32].mxu0 }
 0xf79   : > { %v971_v55 = vadd.f32 %v3720_v20, %v970_v54  ;;  %v2911_v56 = vpop.f32.mrb[33].mxu0 }
 0xf7a   : > { %v973_v57 = vpop.f32.mrb[34].mxu0 }
 0xf7b   : > { %3222 = vtanh.f32 %v971_v55  ;;  %v2912_v58 = vpop.f32.mrb[35].mxu0 }
 0xf85   : > { %v3223_v59 = vpop.eup %3222 }
 0xf86   : > { %v977_v60 = vpack.c.bf16 %v3223_v59, %v3223_v59 }
 0xf88   : > { %2918 = vmatmul.mubr.msk.bf16.vlgmr.msra.gmra.mrb[32].mxu1 %vm200_vm1, %v977_v60 }
 0xf89   : > { %2930 = vmatpush3.bf16.msra.mxu1 %v3707_v11  ;;  %2933 = vmatprep.mubr.msk.bf16.mxu1 %vm3498_vm0, %v3497_v27 }
 0xf8a   : > { %2931 = vmatprep.subr.bf16.mxu1 %v3497_v27 }
 0xf8d   : > { %2932 = vmatpush3.bf16.msra.mxu1 %v3709_v13 }
 0xf8e   : > { %2945 = vmatprep.subr.bf16.mxu1 %v3497_v27 }
0x105b   : > { %v1015_v61 = vpop.f32.mrb[32].mxu1 }
0x105c   : > { %v3943_v62 = vadd.f32 %v3725_v21, %v1015_v61  ;;  %v2919_v63 = vpop.f32.mrb[33].mxu1 }
0x105d   : > { %v1018_v0 = vpop.f32.mrb[34].mxu1 }
0x105e   : > { %v1021_v1 = vmul.f32 %v3943_v62, %v3789_v44  ;;  %v2920_v2 = vpop.f32.mrb[35].mxu1 }
0x1060   : > { %v1022_v4 = vadd.f32 %v1021_v1, %v3886_v14 }
0x1062   : > { %v1023_v7 = vpack.c.bf16 %v1022_v4, %v1022_v4 }
0x1064   : > { %2926 = vmatmul.mubr.msk.bf16.vlgmr.msra.gmra.mrb[36].mxu0 %vm200_vm1, %v1023_v7 }
0x1065   : > { %2938 = vmatpush3.bf16.msra.mxu0 %v3711_v17  ;;  %2941 = vmatprep.mubr.msk.bf16.mxu0 %vm3498_vm0, %v3497_v27 }
0x1066   : > { %2939 = vmatprep.subr.bf16.mxu0 %v3497_v27 }
0x1069   : > { %2940 = vmatpush3.bf16.msra.mxu0 %v3713_v18 }
0x106a   : > { %2953 = vmatprep.subr.bf16.mxu0 %v3497_v27 }
0x1137   : > { %v1061_v9 = vpop.f32.mrb[36].mxu0 }
0x1138   : > { %v1062_v10 = vadd.f32 %v3715_v19, %v1061_v9  ;;  %v2927_v12 = vpop.f32.mrb[37].mxu0 }
0x1139   : > { %v1064_v3 = vpop.f32.mrb[38].mxu0 }
0x113a   : > { %3224 = vtanh.f32 %v1062_v10  ;;  %v2928_v45 = vpop.f32.mrb[39].mxu0 }
0x1144   : > { %v3225_v26 = vpop.eup %3224 }
0x1145   : > { %v1068_v15 = vpack.c.bf16 %v3225_v26, %v3225_v26 }
0x1147   : > { %2934 = vmatmul.mubr.msk.bf16.vlgmr.msra.gmra.mrb[36].mxu1 %vm200_vm1, %v1068_v15 }
0x1148   : > { %2946 = vmatpush3.bf16.msra.mxu1 %v3691_v5  ;;  %2949 = vmatprep.mubr.msk.bf16.mxu1 %vm3498_vm0, %v3497_v27 }
0x1149   : > { %2947 = vmatprep.subr.bf16.mxu1 %v3497_v27 }
0x114c   : > { %2948 = vmatpush3.bf16.msra.mxu1 %v3699_v8 }
0x114d   : > { %2961 = vmatprep.subr.bf16.mxu1 %v3497_v27 }
0x121a   : > { %v1106_v16 = vpop.f32.mrb[36].mxu1 }
0x121b   : > { %v1107_v24 = vadd.f32 %v3720_v20, %v1106_v16  ;;  %v2935_v25 = vpop.f32.mrb[37].mxu1 }
0x121c   : > { %v1109_v28 = vpop.f32.mrb[38].mxu1 }
0x121d   : > { %3226 = vtanh.f32 %v1107_v24  ;;  %v2936_v29 = vpop.f32.mrb[39].mxu1 }
0x1227   : > { %v3227_v30 = vpop.eup %3226 }
0x1228   : > { %v1113_v31 = vpack.c.bf16 %v3227_v30, %v3227_v30 }
0x122a   : > { %2942 = vmatmul.mubr.msk.bf16.vlgmr.msra.gmra.mrb[40].mxu0 %vm200_vm1, %v1113_v31 }
0x122b   : > { %2954 = vmatpush3.bf16.msra.mxu0 %v3707_v11  ;;  %2957 = vmatprep.mubr.msk.bf16.mxu0 %vm3498_vm0, %v3497_v27 }
0x122c   : > { %2955 = vmatprep.subr.bf16.mxu0 %v3497_v27 }
0x122f   : > { %2956 = vmatpush3.bf16.msra.mxu0 %v3709_v13 }
0x1230   : > { %2969 = vmatprep.subr.bf16.mxu0 %v3497_v27 }
0x12fd   : > { %v1151_v32 = vpop.f32.mrb[40].mxu0 }
0x12fe   : > { %v1152_v33 = vadd.f32 %v3725_v21, %v1151_v32  ;;  %v2943_v34 = vpop.f32.mrb[41].mxu0 }
0x12ff   : > { %v1154_v35 = vpop.f32.mrb[42].mxu0 }
0x1300   : > { %v1157_v36 = vmul.f32 %v1152_v33, %v3850_v38  ;;  %v2944_v39 = vpop.f32.mrb[43].mxu0  ;;  %v1293_v58 = vadd.f32 %v1152_v33, %v3943_v62 }
0x1302   : > { %v1158_v40 = vadd.f32 %v1157_v36, %v3886_v14  ;;  %v1294_v59 = vmul.f32 2.0, %v1293_v58 }
0x1304   : > { %v1159_v41 = vpack.c.bf16 %v1158_v40, %v1158_v40  ;;  %v1295_v63 = vadd.f32 %v1294_v59, %v3914_v37 }
0x1306   : > { %2950 = vmatmul.mubr.msk.bf16.vlgmr.msra.gmra.mrb[40].mxu1 %vm200_vm1, %v1159_v41 }
0x1307   : > { %2962 = vmatpush3.bf16.msra.mxu1 %v3711_v17  ;;  %2965 = vmatprep.mubr.msk.bf16.mxu1 %vm3498_vm0, %v3497_v27 }
0x1308   : > { %2963 = vmatprep.subr.bf16.mxu1 %v3497_v27 }
0x130b   : > { %2964 = vmatpush3.bf16.msra.mxu1 %v3713_v18 }
0x130c   : > { %2977 = vmatprep.subr.bf16.mxu1 %v3497_v27 }
0x13d9   : > { %v1197_v42 = vpop.f32.mrb[40].mxu1 }
0x13da   : > { %v1198_v43 = vadd.f32 %v3715_v19, %v1197_v42  ;;  %v2951_v46 = vpop.f32.mrb[41].mxu1 }
0x13db   : > { %v1200_v47 = vpop.f32.mrb[42].mxu1 }
0x13dc   : > { %3228 = vtanh.f32 %v1198_v43  ;;  %v2952_v48 = vpop.f32.mrb[43].mxu1 }
0x13e6   : > { %v3229_v49 = vpop.eup %3228 }
0x13e7   : > { %v1204_v50 = vpack.c.bf16 %v3229_v49, %v3229_v49 }
0x13e9   : > { %2958 = vmatmul.mubr.msk.bf16.vlgmr.msra.gmra.mrb[44].mxu0 %vm200_vm1, %v1204_v50 }
0x13ea   : > { %2970 = vmatpush3.bf16.msra.mxu0 %v3691_v5  ;;  %2973 = vmatprep.mubr.msk.bf16.mxu0 %vm3498_vm0, %v3497_v27 }
0x13eb   : > { %2971 = vmatprep.subr.bf16.mxu0 %v3497_v27 }
0x13ee   : > { %2972 = vmatpush3.bf16.msra.mxu0 %v3699_v8 }
0x13ef   : > { %2985 = vmatprep.subr.bf16.mxu0 %v3497_v27 }
0x14bc   : > { %v1242_v51 = vpop.f32.mrb[44].mxu0 }
0x14bd   : > { %v1243_v52 = vadd.f32 %v3720_v20, %v1242_v51  ;;  %v2959_v53 = vpop.f32.mrb[45].mxu0 }
0x14be   : > { %v1245_v54 = vpop.f32.mrb[46].mxu0 }
0x14bf   : > { %3230 = vtanh.f32 %v1243_v52  ;;  %v2960_v55 = vpop.f32.mrb[47].mxu0 }
0x14c9   : > { %v3231_v56 = vpop.eup %3230 }
0x14ca   : > { %v1249_v57 = vpack.c.bf16 %v3231_v56, %v3231_v56 }
0x14cc   : > { %2966 = vmatmul.mubr.msk.bf16.vlgmr.msra.gmra.mrb[44].mxu1 %vm200_vm1, %v1249_v57 }
0x14cd   : > { %2978 = vmatpush3.bf16.msra.mxu1 %v3707_v11  ;;  %2981 = vmatprep.mubr.msk.bf16.mxu1 %vm3498_vm0, %v3497_v27 }
0x14ce   : > { %2979 = vmatprep.subr.bf16.mxu1 %v3497_v27 }
0x14d1   : > { %2980 = vmatpush3.bf16.msra.mxu1 %v3709_v13 }
0x14d2   : > { %2993 = vmatprep.subr.bf16.mxu1 %v3497_v27 }
0x159f   : > { %v1287_v60 = vpop.f32.mrb[44].mxu1 }
0x15a0   : > { %v1288_v61 = vadd.f32 %v3725_v21, %v1287_v60  ;;  %v2967_v0 = vpop.f32.mrb[45].mxu1 }
0x15a1   : > { %v1290_v1 = vpop.f32.mrb[46].mxu1 }
0x15a2   : > { %v1296_v2 = vadd.f32 %v1295_v63, %v1288_v61  ;;  %v2968_v4 = vpop.f32.mrb[47].mxu1 }
0x15a4   : > { %v1297_v7 = vmul.f32 %v1296_v2, %v3882_v6 }
0x15a6   : > { %v4002_v9 = vadd.f32 %v1297_v7, %v3886_v14 }
0x15a8   : > { %v1299_v10 = vpack.c.bf16 %v4002_v9, %v4002_v9 }
0x15aa   : > { %2974 = vmatmul.mubr.msk.bf16.vlgmr.msra.gmra.mrb[48].mxu0 %vm200_vm1, %v1299_v10 }
0x15ab   : > { %2986 = vmatpush3.bf16.msra.mxu0 %v3711_v17  ;;  %2989 = vmatprep.mubr.msk.bf16.mxu0 %vm3498_vm0, %v3497_v27 }
0x15ac   : > { %2987 = vmatprep.subr.bf16.mxu0 %v3497_v27 }
0x15af   : > { %2988 = vmatpush3.bf16.msra.mxu0 %v3713_v18 }
0x15b0   : > { %3001 = vmatprep.subr.bf16.mxu0 %v3497_v27 }
0x167d   : > { %v1337_v37 = vpop.f32.mrb[48].mxu0 }
0x167e   : > { %v1338_v14 = vadd.f32 %v3715_v19, %v1337_v37  ;;  %v2975_v62 = vpop.f32.mrb[49].mxu0 }
0x167f   : > { %v1340_v12 = vpop.f32.mrb[50].mxu0 }
0x1680   : > { %3232 = vtanh.f32 %v1338_v14  ;;  %v2976_v3 = vpop.f32.mrb[51].mxu0 }
0x168a   : > { %v3233_v45 = vpop.eup %3232 }
0x168b   : > { %v1344_v26 = vpack.c.bf16 %v3233_v45, %v3233_v45 }
0x168d   : > { %2982 = vmatmul.mubr.msk.bf16.vlgmr.msra.gmra.mrb[48].mxu1 %vm200_vm1, %v1344_v26 }
0x168e   : > { %2994 = vmatpush3.bf16.msra.mxu1 %v3691_v5  ;;  %2997 = vmatprep.mubr.msk.bf16.mxu1 %vm3498_vm0, %v3497_v27 }
0x168f   : > { %2995 = vmatprep.subr.bf16.mxu1 %v3497_v27 }
0x1692   : > { %2996 = vmatpush3.bf16.msra.mxu1 %v3699_v8 }
0x1693   : > { %3009 = vmatprep.subr.bf16.mxu1 %v3497_v27 }
0x1760   : > { %v1382_v15 = vpop.f32.mrb[48].mxu1 }
0x1761   : > { %v1383_v16 = vadd.f32 %v3720_v20, %v1382_v15  ;;  %v2983_v24 = vpop.f32.mrb[49].mxu1 }
0x1762   : > { %v1385_v25 = vpop.f32.mrb[50].mxu1 }
0x1763   : > { %3234 = vtanh.f32 %v1383_v16  ;;  %v2984_v28 = vpop.f32.mrb[51].mxu1 }
0x176d   : > { %v3235_v29 = vpop.eup %3234 }
0x176e   : > { %v1389_v30 = vpack.c.bf16 %v3235_v29, %v3235_v29 }
0x1770   : > { %2990 = vmatmul.mubr.msk.bf16.vlgmr.msra.gmra.mrb[52].mxu0 %vm200_vm1, %v1389_v30 }
0x1771   : > { %3002 = vmatpush3.bf16.msra.mxu0 %v3707_v11  ;;  %3005 = vmatprep.mubr.msk.bf16.mxu0 %vm3498_vm0, %v3497_v27 }
0x1772   : > { %3003 = vmatprep.subr.bf16.mxu0 %v3497_v27 }
0x1775   : > { %3004 = vmatpush3.bf16.msra.mxu0 %v3709_v13 }
0x1776   : > { %3017 = vmatprep.subr.bf16.mxu0 %v3497_v27 }
0x1843   : > { %v1427_v31 = vpop.f32.mrb[52].mxu0 }
0x1844   : > { %v4030_v32 = vadd.f32 %v3725_v21, %v1427_v31  ;;  %v2991_v33 = vpop.f32.mrb[53].mxu0 }
0x1845   : > { %v1430_v34 = vpop.f32.mrb[54].mxu0 }
0x1846   : > { %v1433_v35 = vmul.f32 %v4030_v32, %v3789_v44  ;;  %v2992_v36 = vpop.f32.mrb[55].mxu0 }
0x1848   : > { %v1434_v39 = vadd.f32 %v1433_v35, %v4002_v9 }
0x184a   : > { %v1435_v40 = vpack.c.bf16 %v1434_v39, %v1434_v39 }
0x184c   : > { %2998 = vmatmul.mubr.msk.bf16.vlgmr.msra.gmra.mrb[52].mxu1 %vm200_vm1, %v1435_v40 }
0x184d   : > { %3010 = vmatpush3.bf16.msra.mxu1 %v3711_v17  ;;  %3013 = vmatprep.mubr.msk.bf16.mxu1 %vm3498_vm0, %v3497_v27 }
0x184e   : > { %3011 = vmatprep.subr.bf16.mxu1 %v3497_v27 }
0x1851   : > { %3012 = vmatpush3.bf16.msra.mxu1 %v3713_v18 }
0x1852   : > { %3025 = vmatprep.subr.bf16.mxu1 %v3497_v27 }
0x191f   : > { %v1473_v41 = vpop.f32.mrb[52].mxu1 }
0x1920   : > { %v1474_v42 = vadd.f32 %v3715_v19, %v1473_v41  ;;  %v2999_v43 = vpop.f32.mrb[53].mxu1 }
0x1921   : > { %v1476_v46 = vpop.f32.mrb[54].mxu1 }
0x1922   : > { %3236 = vtanh.f32 %v1474_v42  ;;  %v3000_v47 = vpop.f32.mrb[55].mxu1 }
0x192c   : > { %v3237_v48 = vpop.eup %3236 }
0x192d   : > { %v1480_v49 = vpack.c.bf16 %v3237_v48, %v3237_v48 }
0x192f   : > { %3006 = vmatmul.mubr.msk.bf16.vlgmr.msra.gmra.mrb[56].mxu0 %vm200_vm1, %v1480_v49 }
0x1930   : > { %3018 = vmatpush3.bf16.msra.mxu0 %v3691_v5  ;;  %3021 = vmatprep.mubr.msk.bf16.mxu0 %vm3498_vm0, %v3497_v27 }
0x1931   : > { %3019 = vmatprep.subr.bf16.mxu0 %v3497_v27 }
0x1934   : > { %3020 = vmatpush3.bf16.msra.mxu0 %v3699_v8 }
0x1935   : > { %3033 = vmatprep.subr.bf16.mxu0 %v3497_v27 }
0x1a02   : > { %v1518_v50 = vpop.f32.mrb[56].mxu0 }
0x1a03   : > { %v1519_v51 = vadd.f32 %v3720_v20, %v1518_v50  ;;  %v3007_v52 = vpop.f32.mrb[57].mxu0 }
0x1a04   : > { %v1521_v53 = vpop.f32.mrb[58].mxu0 }
0x1a05   : > { %3238 = vtanh.f32 %v1519_v51  ;;  %v3008_v54 = vpop.f32.mrb[59].mxu0 }
0x1a0f   : > { %v3239_v55 = vpop.eup %3238 }
0x1a10   : > { %v1525_v56 = vpack.c.bf16 %v3239_v55, %v3239_v55 }
0x1a12   : > { %3014 = vmatmul.mubr.msk.bf16.vlgmr.msra.gmra.mrb[56].mxu1 %vm200_vm1, %v1525_v56 }
0x1a13   : > { %3026 = vmatpush3.bf16.msra.mxu1 %v3707_v11  ;;  %3029 = vmatprep.mubr.msk.bf16.mxu1 %vm3498_vm0, %v3497_v27 }
0x1a14   : > { %3027 = vmatprep.subr.bf16.mxu1 %v3497_v27 }
0x1a17   : > { %3028 = vmatpush3.bf16.msra.mxu1 %v3709_v13 }
0x1a18   : > { %3041 = vmatprep.subr.bf16.mxu1 %v3497_v27 }
0x1ae5   : > { %v1563_v57 = vpop.f32.mrb[56].mxu1 }
0x1ae6   : > { %v4059_v58 = vadd.f32 %v3725_v21, %v1563_v57  ;;  %v3015_v59 = vpop.f32.mrb[57].mxu1 }
0x1ae7   : > { %v1566_v60 = vpop.f32.mrb[58].mxu1 }
0x1ae8   : > { %v1569_v61 = vmul.f32 %v4059_v58, %v3789_v44  ;;  %v3016_v63 = vpop.f32.mrb[59].mxu1 }
0x1aea   : > { %v1570_v0 = vadd.f32 %v1569_v61, %v4002_v9 }
0x1aec   : > { %v1571_v1 = vpack.c.bf16 %v1570_v0, %v1570_v0 }
0x1aee   : > { %3022 = vmatmul.mubr.msk.bf16.vlgmr.msra.gmra.mrb[60].mxu0 %vm200_vm1, %v1571_v1 }
0x1aef   : > { %3034 = vmatpush3.bf16.msra.mxu0 %v3711_v17  ;;  %3037 = vmatprep.mubr.msk.bf16.mxu0 %vm3498_vm0, %v3497_v27 }
0x1af0   : > { %3035 = vmatprep.subr.bf16.mxu0 %v3497_v27 }
0x1af3   : > { %3036 = vmatpush3.bf16.msra.mxu0 %v3713_v18 }
0x1af4   : > { %3049 = vmatprep.subr.bf16.mxu0 %v3497_v27 }
0x1bc1   : > { %v1609_v2 = vpop.f32.mrb[60].mxu0 }
0x1bc2   : > { %v1610_v4 = vadd.f32 %v3715_v19, %v1609_v2  ;;  %v3023_v7 = vpop.f32.mrb[61].mxu0 }
0x1bc3   : > { %v1612_v10 = vpop.f32.mrb[62].mxu0 }
0x1bc4   : > { %3240 = vtanh.f32 %v1610_v4  ;;  %v3024_v37 = vpop.f32.mrb[63].mxu0 }
0x1bce   : > { %v3241_v14 = vpop.eup %3240 }
0x1bcf   : > { %v1616_v62 = vpack.c.bf16 %v3241_v14, %v3241_v14 }
0x1bd1   : > { %3030 = vmatmul.mubr.msk.bf16.vlgmr.msra.gmra.mrb[60].mxu1 %vm200_vm1, %v1616_v62 }
0x1bd2   : > { %3042 = vmatpush3.bf16.msra.mxu1 %v3691_v5  ;;  %3045 = vmatprep.mubr.msk.bf16.mxu1 %vm3498_vm0, %v3497_v27 }
0x1bd3   : > { %3043 = vmatprep.subr.bf16.mxu1 %v3497_v27 }
0x1bd6   : > { %3044 = vmatpush3.bf16.msra.mxu1 %v3699_v8 }
0x1bd7   : > { %3057 = vmatprep.subr.bf16.mxu1 %v3497_v27 }
0x1ca4   : > { %v1654_v12 = vpop.f32.mrb[60].mxu1 }
0x1ca5   : > { %v1655_v3 = vadd.f32 %v3720_v20, %v1654_v12  ;;  %v3031_v45 = vpop.f32.mrb[61].mxu1 }
0x1ca6   : > { %v1657_v26 = vpop.f32.mrb[62].mxu1 }
0x1ca7   : > { %3242 = vtanh.f32 %v1655_v3  ;;  %v3032_v15 = vpop.f32.mrb[63].mxu1 }
0x1cb1   : > { %v3243_v16 = vpop.eup %3242 }
0x1cb2   : > { %v1661_v24 = vpack.c.bf16 %v3243_v16, %v3243_v16 }
0x1cb4   : > { %3038 = vmatmul.mubr.msk.bf16.vlgmr.msra.gmra.mrb[64].mxu0 %vm200_vm1, %v1661_v24 }
0x1cb5   : > { %3050 = vmatpush3.bf16.msra.mxu0 %v3707_v11  ;;  %3053 = vmatprep.mubr.msk.bf16.mxu0 %vm3498_vm0, %v3497_v27 }
0x1cb6   : > { %3051 = vmatprep.subr.bf16.mxu0 %v3497_v27 }
0x1cb9   : > { %3052 = vmatpush3.bf16.msra.mxu0 %v3709_v13 }
0x1cba   : > { %3065 = vmatprep.subr.bf16.mxu0 %v3497_v27 }
0x1d87   : > { %v1699_v25 = vpop.f32.mrb[64].mxu0 }
0x1d88   : > { %v1700_v28 = vadd.f32 %v3725_v21, %v1699_v25  ;;  %v3039_v29 = vpop.f32.mrb[65].mxu0 }
0x1d89   : > { %v1702_v30 = vpop.f32.mrb[66].mxu0 }
0x1d8a   : > { %v1705_v31 = vmul.f32 %v1700_v28, %v3850_v38  ;;  %v3040_v33 = vpop.f32.mrb[67].mxu0  ;;  %v1841_v54 = vadd.f32 %v1700_v28, %v4059_v58 }
0x1d8c   : > { %v1706_v34 = vadd.f32 %v1705_v31, %v4002_v9  ;;  %v1842_v55 = vmul.f32 2.0, %v1841_v54 }
0x1d8e   : > { %v1707_v35 = vpack.c.bf16 %v1706_v34, %v1706_v34  ;;  %v1843_v59 = vadd.f32 %v1842_v55, %v4030_v32 }
0x1d90   : > { %3046 = vmatmul.mubr.msk.bf16.vlgmr.msra.gmra.mrb[64].mxu1 %vm200_vm1, %v1707_v35 }
0x1d91   : > { %3058 = vmatpush3.bf16.msra.mxu1 %v3711_v17  ;;  %3061 = vmatprep.mubr.msk.bf16.mxu1 %vm3498_vm0, %v3497_v27 }
0x1d92   : > { %3059 = vmatprep.subr.bf16.mxu1 %v3497_v27 }
0x1d95   : > { %3060 = vmatpush3.bf16.msra.mxu1 %v3713_v18 }
0x1d96   : > { %3073 = vmatprep.subr.bf16.mxu1 %v3497_v27 }
0x1e63   : > { %v1745_v36 = vpop.f32.mrb[64].mxu1 }
0x1e64   : > { %v1746_v39 = vadd.f32 %v3715_v19, %v1745_v36  ;;  %v3047_v40 = vpop.f32.mrb[65].mxu1 }
0x1e65   : > { %v1748_v41 = vpop.f32.mrb[66].mxu1 }
0x1e66   : > { %3244 = vtanh.f32 %v1746_v39  ;;  %v3048_v42 = vpop.f32.mrb[67].mxu1 }
0x1e70   : > { %v3245_v43 = vpop.eup %3244 }
0x1e71   : > { %v1752_v46 = vpack.c.bf16 %v3245_v43, %v3245_v43 }
0x1e73   : > { %3054 = vmatmul.mubr.msk.bf16.vlgmr.msra.gmra.mrb[68].mxu0 %vm200_vm1, %v1752_v46 }
0x1e74   : > { %3066 = vmatpush3.bf16.msra.mxu0 %v3691_v5  ;;  %3069 = vmatprep.mubr.msk.bf16.mxu0 %vm3498_vm0, %v3497_v27 }
0x1e75   : > { %3067 = vmatprep.subr.bf16.mxu0 %v3497_v27 }
0x1e78   : > { %3068 = vmatpush3.bf16.msra.mxu0 %v3699_v8 }
0x1e79   : > { %3081 = vmatprep.subr.bf16.mxu0 %v3497_v27 }
0x1f46   : > { %v1790_v47 = vpop.f32.mrb[68].mxu0 }
0x1f47   : > { %v1791_v48 = vadd.f32 %v3720_v20, %v1790_v47  ;;  %v3055_v49 = vpop.f32.mrb[69].mxu0 }
0x1f48   : > { %v1793_v50 = vpop.f32.mrb[70].mxu0 }
0x1f49   : > { %3246 = vtanh.f32 %v1791_v48  ;;  %v3056_v51 = vpop.f32.mrb[71].mxu0 }
0x1f53   : > { %v3247_v52 = vpop.eup %3246 }
0x1f54   : > { %v1797_v53 = vpack.c.bf16 %v3247_v52, %v3247_v52 }
0x1f56   : > { %3062 = vmatmul.mubr.msk.bf16.vlgmr.msra.gmra.mrb[68].mxu1 %vm200_vm1, %v1797_v53 }
0x1f57   : > { %3074 = vmatpush3.bf16.msra.mxu1 %v3707_v11  ;;  %3077 = vmatprep.mubr.msk.bf16.mxu1 %vm3498_vm0, %v3497_v27 }
0x1f58   : > { %3075 = vmatprep.subr.bf16.mxu1 %v3497_v27 }
0x1f5b   : > { %3076 = vmatpush3.bf16.msra.mxu1 %v3709_v13 }
0x1f5c   : > { %3089 = vmatprep.subr.bf16.mxu1 %v3497_v27 }
0x2029   : > { %v1835_v56 = vpop.f32.mrb[68].mxu1 }
0x202a   : > { %v1836_v57 = vadd.f32 %v3725_v21, %v1835_v56  ;;  %v3063_v60 = vpop.f32.mrb[69].mxu1 }
0x202b   : > { %v1838_v61 = vpop.f32.mrb[70].mxu1 }
0x202c   : > { %v1844_v63 = vadd.f32 %v1843_v59, %v1836_v57  ;;  %v3064_v0 = vpop.f32.mrb[71].mxu1 }
0x202e   : > { %v1845_v1 = vmul.f32 %v1844_v63, %v3882_v6 }
0x2030   : > { %v4118_v2 = vadd.f32 %v1845_v1, %v4002_v9 }
0x2032   : > { %v1847_v4 = vpack.c.bf16 %v4118_v2, %v4118_v2 }
0x2034   : > { %3070 = vmatmul.mubr.msk.bf16.vlgmr.msra.gmra.mrb[72].mxu0 %vm200_vm1, %v1847_v4 }
0x2035   : > { %3082 = vmatpush3.bf16.msra.mxu0 %v3711_v17  ;;  %3085 = vmatprep.mubr.msk.bf16.mxu0 %vm3498_vm0, %v3497_v27 }
0x2036   : > { %3083 = vmatprep.subr.bf16.mxu0 %v3497_v27 }
0x2039   : > { %3084 = vmatpush3.bf16.msra.mxu0 %v3713_v18 }
0x203a   : > { %3097 = vmatprep.subr.bf16.mxu0 %v3497_v27 }
0x2107   : > { %v1885_v32 = vpop.f32.mrb[72].mxu0 }
0x2108   : > { %v1886_v9 = vadd.f32 %v3715_v19, %v1885_v32  ;;  %v3071_v58 = vpop.f32.mrb[73].mxu0 }
0x2109   : > { %v1888_v7 = vpop.f32.mrb[74].mxu0 }
0x210a   : > { %3248 = vtanh.f32 %v1886_v9  ;;  %v3072_v10 = vpop.f32.mrb[75].mxu0 }
0x2114   : > { %v3249_v37 = vpop.eup %3248 }
0x2115   : > { %v1892_v14 = vpack.c.bf16 %v3249_v37, %v3249_v37 }
0x2117   : > { %3078 = vmatmul.mubr.msk.bf16.vlgmr.msra.gmra.mrb[72].mxu1 %vm200_vm1, %v1892_v14 }
0x2118   : > { %3090 = vmatpush3.bf16.msra.mxu1 %v3691_v5  ;;  %3093 = vmatprep.mubr.msk.bf16.mxu1 %vm3498_vm0, %v3497_v27 }
0x2119   : > { %3091 = vmatprep.subr.bf16.mxu1 %v3497_v27 }
0x211c   : > { %3092 = vmatpush3.bf16.msra.mxu1 %v3699_v8 }
0x211d   : > { %3105 = vmatprep.subr.bf16.mxu1 %v3497_v27 }
0x21ea   : > { %v1930_v62 = vpop.f32.mrb[72].mxu1 }
0x21eb   : > { %v1931_v12 = vadd.f32 %v3720_v20, %v1930_v62  ;;  %v3079_v3 = vpop.f32.mrb[73].mxu1 }
0x21ec   : > { %v1933_v45 = vpop.f32.mrb[74].mxu1 }
0x21ed   : > { %3250 = vtanh.f32 %v1931_v12  ;;  %v3080_v26 = vpop.f32.mrb[75].mxu1 }
0x21f7   : > { %v3251_v15 = vpop.eup %3250 }
0x21f8   : > { %v1937_v16 = vpack.c.bf16 %v3251_v15, %v3251_v15 }
0x21fa   : > { %3086 = vmatmul.mubr.msk.bf16.vlgmr.msra.gmra.mrb[76].mxu0 %vm200_vm1, %v1937_v16 }
0x21fb   : > { %3098 = vmatpush3.bf16.msra.mxu0 %v3707_v11  ;;  %3101 = vmatprep.mubr.msk.bf16.mxu0 %vm3498_vm0, %v3497_v27 }
0x21fc   : > { %3099 = vmatprep.subr.bf16.mxu0 %v3497_v27 }
0x21ff   : > { %3100 = vmatpush3.bf16.msra.mxu0 %v3709_v13 }
0x2200   : > { %3113 = vmatprep.subr.bf16.mxu0 %v3497_v27 }
0x22cd   : > { %v1975_v24 = vpop.f32.mrb[76].mxu0 }
0x22ce   : > { %v4146_v25 = vadd.f32 %v3725_v21, %v1975_v24  ;;  %v3087_v28 = vpop.f32.mrb[77].mxu0 }
0x22cf   : > { %v1978_v29 = vpop.f32.mrb[78].mxu0 }
0x22d0   : > { %v1981_v30 = vmul.f32 %v4146_v25, %v3789_v44  ;;  %v3088_v31 = vpop.f32.mrb[79].mxu0 }
0x22d2   : > { %v1982_v33 = vadd.f32 %v1981_v30, %v4118_v2 }
0x22d4   : > { %v1983_v34 = vpack.c.bf16 %v1982_v33, %v1982_v33 }
0x22d6   : > { %3094 = vmatmul.mubr.msk.bf16.vlgmr.msra.gmra.mrb[76].mxu1 %vm200_vm1, %v1983_v34 }
0x22d7   : > { %3106 = vmatpush3.bf16.msra.mxu1 %v3711_v17  ;;  %3109 = vmatprep.mubr.msk.bf16.mxu1 %vm3498_vm0, %v3497_v27 }
0x22d8   : > { %3107 = vmatprep.subr.bf16.mxu1 %v3497_v27 }
0x22db   : > { %3108 = vmatpush3.bf16.msra.mxu1 %v3713_v18 }
0x22dc   : > { %3121 = vmatprep.subr.bf16.mxu1 %v3497_v27 }
0x23a9   : > { %v2021_v35 = vpop.f32.mrb[76].mxu1 }
0x23aa   : > { %v2022_v36 = vadd.f32 %v3715_v19, %v2021_v35  ;;  %v3095_v39 = vpop.f32.mrb[77].mxu1 }
0x23ab   : > { %v2024_v40 = vpop.f32.mrb[78].mxu1 }
0x23ac   : > { %3252 = vtanh.f32 %v2022_v36  ;;  %v3096_v41 = vpop.f32.mrb[79].mxu1 }
0x23b6   : > { %v3253_v42 = vpop.eup %3252 }
0x23b7   : > { %v2028_v43 = vpack.c.bf16 %v3253_v42, %v3253_v42 }
0x23b9   : > { %3102 = vmatmul.mubr.msk.bf16.vlgmr.msra.gmra.mrb[80].mxu0 %vm200_vm1, %v2028_v43 }
0x23ba   : > { %3114 = vmatpush3.bf16.msra.mxu0 %v3691_v5  ;;  %3117 = vmatprep.mubr.msk.bf16.mxu0 %vm3498_vm0, %v3497_v27 }
0x23bb   : > { %3115 = vmatprep.subr.bf16.mxu0 %v3497_v27 }
0x23be   : > { %3116 = vmatpush3.bf16.msra.mxu0 %v3699_v8 }
0x23bf   : > { %3129 = vmatprep.subr.bf16.mxu0 %v3497_v27 }
0x248c   : > { %v2066_v46 = vpop.f32.mrb[80].mxu0 }
0x248d   : > { %v2067_v47 = vadd.f32 %v3720_v20, %v2066_v46  ;;  %v3103_v48 = vpop.f32.mrb[81].mxu0 }
0x248e   : > { %v2069_v49 = vpop.f32.mrb[82].mxu0 }
0x248f   : > { %3254 = vtanh.f32 %v2067_v47  ;;  %v3104_v50 = vpop.f32.mrb[83].mxu0 }
0x2499   : > { %v3255_v51 = vpop.eup %3254 }
0x249a   : > { %v2073_v52 = vpack.c.bf16 %v3255_v51, %v3255_v51 }
0x249c   : > { %3110 = vmatmul.mubr.msk.bf16.vlgmr.msra.gmra.mrb[80].mxu1 %vm200_vm1, %v2073_v52 }
0x249d   : > { %3122 = vmatpush3.bf16.msra.mxu1 %v3707_v11  ;;  %3125 = vmatprep.mubr.msk.bf16.mxu1 %vm3498_vm0, %v3497_v27 }
0x249e   : > { %3123 = vmatprep.subr.bf16.mxu1 %v3497_v27 }
0x24a1   : > { %3124 = vmatpush3.bf16.msra.mxu1 %v3709_v13 }
0x24a2   : > { %3137 = vmatprep.subr.bf16.mxu1 %v3497_v27 }
0x256f   : > { %v2111_v53 = vpop.f32.mrb[80].mxu1 }
0x2570   : > { %v4175_v54 = vadd.f32 %v3725_v21, %v2111_v53  ;;  %v3111_v55 = vpop.f32.mrb[81].mxu1 }
0x2571   : > { %v2114_v56 = vpop.f32.mrb[82].mxu1 }
0x2572   : > { %v2117_v57 = vmul.f32 %v4175_v54, %v3789_v44  ;;  %v3112_v59 = vpop.f32.mrb[83].mxu1 }
0x2574   : > { %v2118_v60 = vadd.f32 %v2117_v57, %v4118_v2 }
0x2576   : > { %v2119_v61 = vpack.c.bf16 %v2118_v60, %v2118_v60 }
0x2578   : > { %3118 = vmatmul.mubr.msk.bf16.vlgmr.msra.gmra.mrb[84].mxu0 %vm200_vm1, %v2119_v61 }
0x2579   : > { %3130 = vmatpush3.bf16.msra.mxu0 %v3711_v17  ;;  %3133 = vmatprep.mubr.msk.bf16.mxu0 %vm3498_vm0, %v3497_v27 }
0x257a   : > { %3131 = vmatprep.subr.bf16.mxu0 %v3497_v27 }
0x257d   : > { %3132 = vmatpush3.bf16.msra.mxu0 %v3713_v18 }
0x257e   : > { %3145 = vmatprep.subr.bf16.mxu0 %v3497_v27 }
0x264b   : > { %v2157_v63 = vpop.f32.mrb[84].mxu0 }
0x264c   : > { %v2158_v44 = vadd.f32 %v3715_v19, %v2157_v63  ;;  %v3119_v0 = vpop.f32.mrb[85].mxu0 }
0x264d   : > { %v2160_v1 = vpop.f32.mrb[86].mxu0 }
0x264e   : > { %3256 = vtanh.f32 %v2158_v44  ;;  %v3120_v4 = vpop.f32.mrb[87].mxu0 }
0x2658   : > { %v3257_v32 = vpop.eup %3256 }
0x2659   : > { %v2164_v9 = vpack.c.bf16 %v3257_v32, %v3257_v32 }
0x265b   : > { %3126 = vmatmul.mubr.msk.bf16.vlgmr.msra.gmra.mrb[84].mxu1 %vm200_vm1, %v2164_v9 }
0x265c   : > { %3138 = vmatpush3.bf16.msra.mxu1 %v3691_v5  ;;  %3141 = vmatprep.mubr.msk.bf16.mxu1 %vm3498_vm0, %v3497_v27 }
0x265d   : > { %3139 = vmatprep.subr.bf16.mxu1 %v3497_v27 }
0x2660   : > { %3140 = vmatpush3.bf16.msra.mxu1 %v3699_v8 }
0x2661   : > { %3153 = vmatprep.subr.bf16.mxu1 %v3497_v27 }
0x272e   : > { %v2202_v58 = vpop.f32.mrb[84].mxu1 }
0x272f   : > { %v2203_v7 = vadd.f32 %v3720_v20, %v2202_v58  ;;  %v3127_v10 = vpop.f32.mrb[85].mxu1 }
0x2730   : > { %v2205_v37 = vpop.f32.mrb[86].mxu1 }
0x2731   : > { %3258 = vtanh.f32 %v2203_v7  ;;  %v3128_v14 = vpop.f32.mrb[87].mxu1 }
0x273b   : > { %v3259_v62 = vpop.eup %3258 }
0x273c   : > { %v2209_v12 = vpack.c.bf16 %v3259_v62, %v3259_v62 }
0x273e   : > { %3134 = vmatmul.mubr.msk.bf16.vlgmr.msra.gmra.mrb[88].mxu0 %vm200_vm1, %v2209_v12 }
0x273f   : > { %3146 = vmatpush3.bf16.msra.mxu0 %v3707_v11  ;;  %3149 = vmatprep.mubr.msk.bf16.mxu0 %vm3498_vm0, %v3497_v27 }
0x2740   : > { %3147 = vmatprep.subr.bf16.mxu0 %v3497_v27 }
0x2743   : > { %3148 = vmatpush3.bf16.msra.mxu0 %v3709_v13 }
0x2811   : > { %v2247_v3 = vpop.f32.mrb[88].mxu0 }
0x2812   : > { %v2248_v45 = vadd.f32 %v3725_v21, %v2247_v3  ;;  %v3135_v26 = vpop.f32.mrb[89].mxu0 }
0x2813   : > { %v2250_v15 = vpop.f32.mrb[90].mxu0 }
0x2814   : > { %v2253_v16 = vmul.f32 %v2248_v45, %v3850_v38  ;;  %v3136_v24 = vpop.f32.mrb[91].mxu0  ;;  %v2389_v47 = vadd.f32 %v2248_v45, %v4175_v54 }
0x2816   : > { %v2254_v28 = vadd.f32 %v2253_v16, %v4118_v2  ;;  %v2390_v48 = vmul.f32 2.0, %v2389_v47 }
0x2818   : > { %v2255_v29 = vpack.c.bf16 %v2254_v28, %v2254_v28  ;;  %v2391_v51 = vadd.f32 %v2390_v48, %v4146_v25 }
0x281a   : > { %3142 = vmatmul.mubr.msk.bf16.vlgmr.msra.gmra.mrb[88].mxu1 %vm200_vm1, %v2255_v29 }
0x281b   : > { %3154 = vmatpush3.bf16.msra.mxu1 %v3711_v17  ;;  %3157 = vmatprep.mubr.msk.bf16.mxu1 %vm3498_vm0, %v3497_v27 }
0x281c   : > { %3155 = vmatprep.subr.bf16.mxu1 %v3497_v27 }
0x281f   : > { %3156 = vmatpush3.bf16.msra.mxu1 %v3713_v18 }
0x28ed   : > { %v2293_v30 = vpop.f32.mrb[88].mxu1 }
0x28ee   : > { %v2294_v31 = vadd.f32 %v3715_v19, %v2293_v30  ;;  %v3143_v33 = vpop.f32.mrb[89].mxu1 }
0x28ef   : > { %v2296_v38 = vpop.f32.mrb[90].mxu1 }
0x28f0   : > { %3260 = vtanh.f32 %v2294_v31  ;;  %v3144_v34 = vpop.f32.mrb[91].mxu1 }
0x28fa   : > { %v3261_v35 = vpop.eup %3260 }
0x28fb   : > { %v2300_v36 = vpack.c.bf16 %v3261_v35, %v3261_v35 }
0x28fd   : > { %3150 = vmatmul.mubr.msk.bf16.vlgmr.msra.gmra.mrb[92].mxu0 %vm200_vm1, %v2300_v36 }
0x29d0   : > { %v2338_v39 = vpop.f32.mrb[92].mxu0 }
0x29d1   : > { %v2339_v40 = vadd.f32 %v3720_v20, %v2338_v39  ;;  %v3151_v41 = vpop.f32.mrb[93].mxu0 }
0x29d2   : > { %v2341_v42 = vpop.f32.mrb[94].mxu0 }
0x29d3   : > { %3262 = vtanh.f32 %v2339_v40  ;;  %v3152_v27 = vpop.f32.mrb[95].mxu0 }
0x29dd   : > { %v3263_v43 = vpop.eup %3262 }
0x29de   : > { %v2345_v46 = vpack.c.bf16 %v3263_v43, %v3263_v43 }
0x29e0   : > { %3158 = vmatmul.mubr.msk.bf16.vlgmr.msra.gmra.mrb[92].mxu1 %vm200_vm1, %v2345_v46 }
0x2ab3   : > { %v2383_v49 = vpop.f32.mrb[92].mxu1 }
0x2ab4   : > { %v2384_v50 = vadd.f32 %v3725_v21, %v2383_v49  ;;  %v3159_v52 = vpop.f32.mrb[93].mxu1  ;;  %2398 = sbr.rel (%p2627_p9) target bundleno = 10941 (0x2abd), region = 96 }
0x2ab5   : > { %v2386_v53 = vpop.f32.mrb[94].mxu1 }
0x2ab6   : > { %v2392_v55 = vadd.f32 %v2391_v51, %v2384_v50  ;;  %v3160_v56 = vpop.f32.mrb[95].mxu1 }
0x2ab8   : > { %v2393_v57 = vmul.f32 %v2392_v55, %v3882_v6 }
0x2aba   : > { %v2394_v26 = vadd.f32 %v2393_v57, %v4118_v2  }
0x2abc   : > { %2403 = vst.msk [vmem:[%s2401_s18] sm:$0x3] %vm2402_vm2, %v2394_v26 }
0x2abd PF: > { %s191_s9 = sadd.s32 1, %s3486_s9  }
0x2abe   : > { %p188_p10 = scmp.ge.s32.totalorder %s191_s9, 8  }
0x2abf   :  { %v2630_v6 = vld [vmem:[%s4291_s12] ss:$0 sm:$0xff] (%p188_p10)  ;;  %vm2415_vm3 = vcmask (%p188_p10), 254976   ;;  %v3499_v60 = vmov (%p188_p10), 0   ;;  %3266 = vlog2.f32 (%p188_p10), %v3732_v23  ;;  %v2631_v8 = vld [vmem:[#allocation4] ss:$0 sm:$0xff] (%p188_p10)  ;;  %v2449_v11 = vmul.f32 (%p188_p10), %v3732_v23, %v3732_v23 }
0x2ac0   :  { %190 = sbr.rel (!%p188_p10) target bundleno = 141 (0x8d), region = 134  ;;  %3264 = vset.pattern.permute.xlu1 (%p188_p10), %v3499_v60  ;;  %3265 = vset.pattern.permute.xlu0 (%p188_p10), %v3499_v60  ;;  %v2450_v13 = vmul.f32 (%p188_p10), %v3730_v22, %v3730_v22  ;;  %vm2427_vm4 = vcmask (%p188_p10), 7168   ;;  %vm2429_vm5 = vcmask (%p188_p10), 15360   ;;  %v2444_v37 = vld [vmem:[#allocation13] sm:$0x3] (%p188_p10)  ;;  %vm2442_vm6 = vcmask (%p188_p10), 17408  }
0x2ac1   :  { %s2470_s12 = sld [smem:[#allocation3]] (%p188_p10)  ;;  %vm2474_vm7 = vcmask (%p188_p10), 1041408   ;;  %vm2487_vm8 = vcmask (%p188_p10), 1024   ;;  %s3500_s7 = smov (%p188_p10), [#allocation19]  }
0x2ac2   :  { %v2451_v17 = vadd.f32 (%p188_p10), %v2450_v13, %v2449_v11  ;;  %s2528_s21 = sshll.u32 (%p188_p10), %s3500_s7, 4  ;;  %s2529_s21 = int_to_ptr.vmem [resolvable:$true] %s2528_s21 }
0x2ac3   :  { %v2405_v2 = vld [vmem:[#allocation2] sm:$0x3] (%p188_p10)  ;;  %v2407_v54 = vld [vmem:[#allocation2 + $0x4] sm:$0x3] (%p188_p10)  ;;  %v2406_v59 = vld [vmem:[#allocation2 + $0x2] sm:$0x3] (%p188_p10)  ;;  %p3419_p12 = scmp.lt.s32.totalorder (%p188_p10), %s2529_s21, %s2529_s21 }
0x2ac4   :  { %v2414_v25 = vmul.f32 (%p188_p10), %v2630_v6, %v2405_v2  ;;  %v2423_v61 = vmul.f32 (%p188_p10), %v2630_v6, %v2407_v54  ;;  %v2419_v63 = vmul.f32 (%p188_p10), %v2630_v6, %v2406_v59  ;;  %v2632_v20 = vadd.f32 (%p188_p10), -1.0, %v2451_v17  ;;  %s3414_s24 = scalar_lea.vmem (%p188_p10), %s2529_s21, 32 }
0x2ac5   :  { %p3415_p11 = scmp.ne.s32.totalorder (%p188_p10), %s2529_s21, %s3414_s24  ;;  %p3420_p13 = scmp.lt.s32.totalorder (%p188_p10), %s3414_s24, %s3414_s24 }
0x2ac6   :  { %v2416_v44 = vsel (%p188_p10), %vm2415_vm3, %v2414_v25, 0.0  ;;  %v2424_v0 = vsel (%p188_p10), %vm2415_vm3, %v2423_v61, 0.0  ;;  %v2420_v5 = vsel (%p188_p10), %vm2415_vm3, %v2419_v63, 0.0  ;;  %v2453_v1 = vmul.f32 (%p188_p10), 0.5, %v2632_v20 }
0x2ac7   :  { %2417 = vadd.xlane.f32.xlu0 %v2416_v44  ;;  %2425 = vadd.xlane.f32.xlu1 %v2424_v0  ;;  %v2471_v30 = vstv %s2470_s12  ;;  %p3421_p0 = por %p3420_p13, %p3419_p12 }
0x2ac9   :  { %v3267_v18 = vpop.eup %3266  ;;  %p3422_p1 = pnand %p3421_p0, %p3415_p11 }
0x2aca   :  { %v2447_v19 = vmul.f32 0.6931472, %v3267_v18 }
0x2acb   :  { %2421 = vadd.xlane.f32.xlu0 %v2420_v5 }
0x2acc   :  { %v2448_v21 = vsub.f32 0.0, %v2447_v19 }
0x2ace   :  { %v2454_v4 = vadd.f32 %v2453_v1, %v2448_v21 }
0x2ad0   :  { %v2455_v32 = vsel %vm2415_vm3, %v2454_v4, 0.0 }
0x2ad1   :  { %2456 = vadd.xlane.f32.xlu0 %v2455_v32 }
0x2ad8   :  { %2438 = vperm.xlu1 %3264, %v2631_v8  }
0x2b54   :  { %v2418_v9 = vpop.xlane.xlu0 %2417  ;;  %v2426_v58 = vpop.xlane.xlu1 %2425 }
0x2b58   :  { %v2422_v7 = vpop.xlane.xlu0 %2421  ;;  %v2439_v23 = vpop.permute.xlu1 %2438 }
0x2b59   :  { %v2428_v10 = vsel %vm2427_vm4, %v2418_v9, %v2422_v7 }
0x2b5a   :  { %v2430_v14 = vsel %vm2429_vm5, %v2428_v10, %v2426_v58 }
0x2b5b   :  { %v2441_v22 = vadd.f32 %v2439_v23, %v2430_v14 }
0x2b5d   :  { %v2445_v62 = vsub.f32 %v2441_v22, %v2444_v37  ;;  %2443 = vst.msk [vmem:[#allocation19] sm:$0x3] %vm2442_vm6, %v2441_v22 }
0x2b5e   :  { %v2457_v28 = vpop.xlane.xlu0 %2456 }
0x2b5f   :  { %v2461_v12 = vmul.f32 100.0, %v2445_v62  ;;  %v2504_v3 = vmul.f32 %v2445_v62, %v2445_v62  ;;  %v2459_v29 = vmul.f32 0.03125, %v2457_v28 }
0x2b61   :  { %v2462_v45 = vmul.f32 %v2461_v12, %v2461_v12  ;;  %v2505_v26 = vsel %vm2442_vm6, %v2504_v3, 0.0  ;;  %v2472_v33 = vmul.f32 %v2471_v30, %v2459_v29 }
0x2b63   :  { %v2463_v15 = vmul.f32 0.5, %v2462_v45 }
0x2b65   :  { %v2464_v16 = vsub.f32 3.6862316, %v2463_v15 }
0x2b67   :  { %v2465_v24 = vsel %vm2442_vm6, %v2464_v16, 0.0 }
0x2b68   :  { %2466 = vadd.xlane.f32.xlu0 %v2465_v24 }
0x2bf5   :  { %v2467_v31 = vpop.xlane.xlu0 %2466 }
0x2bf6   :  { %v2469_v38 = vmul.f32 0.125, %v2467_v31 }
0x2bf8   :  { %v2473_v34 = vsub.f32 %v2469_v38, %v2472_v33 }
0x2bfa   :  { %v2475_v35 = vsel %vm2474_vm7, %v2473_v34, -inf }
0x2bfb   :  { %v2476_v36 = vrot.slane %v2475_v35, 4 }
0x2bfd   :  { %v2477_v39 = vmax.f32 %v2475_v35, %v2476_v36 }
0x2bff   :  { %v2478_v40 = vrot.slane %v2477_v39, 2 }
0x2c01   :  { %v2479_v41 = vmax.f32 %v2477_v39, %v2478_v40 }
0x2c03   :  { %v2480_v42 = vrot.slane %v2479_v41, 1 }
0x2c05   :  { %v2481_v27 = vmax.f32 %v2479_v41, %v2480_v42 }
0x2c07   :  { %3161 = vpush %v2481_v27 }
0x2c38   :  { %s4239_s23 = spop %3161 }
0x2c39   :  { %v2483_v43 = vstv %s4239_s23 }
0x2c3a   :  { %v2484_v46 = vsub.f32 %v2473_v34, %v2483_v43 }
0x2c3c   :  { %v2485_v47 = vmul.f32 1.442695, %v2484_v46 }
0x2c3e   :  { %3268 = vpow2.f32 %v2485_v47 }
0x2c48   :  { %v3269_v48 = vpop.eup %3268 }
0x2c49   :  { %v2488_v49 = vsel %vm2487_vm8, %v3269_v48, 0.0 }
0x2c4a   :  { %2489 = vadd.xlane.f32.xlu0 %v2488_v49 }
0x2c4e   :  { %2506 = vadd.xlane.f32.xlu0 %v2505_v26 }
0x2cd7   :  { %v2490_v50 = vpop.xlane.xlu0 %2489 }
0x2cd8   :  { %v2491_v51 = vrot.slane %v2490_v50, 4 }
0x2cda   :  { %v2492_v52 = vadd.f32 %v2491_v51, %v2490_v50 }
0x2cdc   :  { %v2493_v53 = vrot.slane %v2492_v52, 2 }
0x2cdd   :  { %3425 = shalt.err (!%p3422_p1)
}
0x2cde   :  { %s3426_s4 = scalar_lea.hbm %s4293_s14, 32 }
0x2cdf   :  { %p3427_p2 = scmp.ne.s32.totalorder %s4293_s14, %s3426_s4  ;;  %p3430_p3 = scmp.lt.u32.totalorder %s3426_s4, %s4293_s14 }
0x2ce1   :  { %p3432_p4 = pnand %p3430_p3, %p3427_p2 }
0x2ce3   :  { %3435 = shalt.err (!%p3432_p4)
}
0x2ce4   :  { %2531 = dma.vmem_to_hbm [thread:$0]  %s2529_s21, 32, %s4293_s14, [#allocation7]   ;;  %v2494_v55 = vadd.f32 %v2493_v53, %v2492_v52  ;;  %v2507_v6 = vpop.xlane.xlu0 %2506 }
0x2ce5   :  { %v2508_v2 = vrot.slane %v2507_v6, 4  ;;  %s3436_s0 = scalar_lea.hbm %s4294_s15, 16 }
0x2ce6   :  { %v2495_v56 = vrot.slane %v2494_v55, 1  ;;  %p3437_p5 = scmp.ne.s32.totalorder %s4294_s15, %s3436_s0  ;;  %p3440_p6 = scmp.lt.u32.totalorder %s3436_s0, %s4294_s15 }
0x2ce7   :  { %v2509_v25 = vadd.f32 %v2508_v2, %v2507_v6 }
0x2ce8   :  { %v2496_v57 = vadd.f32 %v2495_v56, %v2494_v55  ;;  %p3442_p7 = pnand %p3440_p6, %p3437_p5 }
0x2ce9   :  { %v2510_v59 = vrot.slane %v2509_v25, 2 }
0x2cea   :  { %3163 = vpush %v2496_v57 }
0x2ceb   :  { %v2511_v60 = vadd.f32 %v2510_v59, %v2509_v25 }
0x2ced   :  { %v2512_v61 = vrot.slane %v2511_v60, 1 }
0x2cef   :  { %v2513_v0 = vadd.f32 %v2512_v61, %v2511_v60 }
0x2d1b   :  { %s3164_s8 = spop %3163 }
0x2d1c   :  { %v2498_v54 = vstv %s3164_s8 }
0x2d1d   :  { %3270 = vlog2.f32 %v2498_v54 }
0x2d27   :  { %v3271_v63 = vpop.eup %3270 }
0x2d28   :  { %v2500_v44 = vmul.f32 0.6931472, %v3271_v63 }
0x2d2a   :  { %3165 = vpush %v2500_v44 }
0x2d2b   :  { %3167 = vpush %v2513_v0 }
0x2d5b   :  { %s3166_s14 = spop %3165 }
0x2d5c   :  { %s2502_s13 = sadd.f32 %s3166_s14, %s4239_s23  ;;  %s3168_s29 = spop %3167 }
0x2d5d   :  { %s2517_s30 = smul.f32 0.16666667, %s3168_s29 }
0x2d5e   :  { %s2503_s9 = ssub.f32 0.0, %s2502_s13 }
0x2d5f   :  { %2521 = sst [smem:[#allocation21]] %s2517_s30 }
0x2d60   :  { %2519 = sst [smem:[#allocation20]] %s2503_s9 }
0x2d61   :  { %3445 = shalt.err (!%p3442_p7)
}
0x2d62   :  { %s3501_s20 = smov [#allocation20]   ;;  %s3446_s21 = scalar_lea.hbm %s4295_s16, 16 }
0x2d63   :  { %2539 = dma.smem_to_hbm %s3501_s20, 16, %s4294_s15, [#allocation9]  }
0x2d64   :  { %p3447_p8 = scmp.ne.s32.totalorder %s4295_s16, %s3446_s21  ;;  %p3450_p9 = scmp.lt.u32.totalorder %s3446_s21, %s4295_s16 }
0x2d66   :  { %p3452_p10 = pnand %p3450_p9, %p3447_p8 }
0x2d68   :  { %3455 = shalt.err (!%p3452_p10)
}
0x2d69   :  { %s3502_s26 = smov [#allocation21]  }
0x2d6a   :  { %2547 = dma.smem_to_hbm %s3502_s26, 16, %s4295_s16, [#allocation22]  }
0x2d6b   :  { %3474 = dma.done.wait [#allocation7], 32  }
0x2d6c   :  { %3475 = vsyncadd [#allocation7], 4294967264 }
0x2d6d   :  { %3476 = dma.done.wait [#allocation9], 16  }
0x2d6e   :  { %3477 = vsyncadd [#allocation9], 4294967280 }
0x2d6f   :  { %3478 = dma.done.wait [#allocation22], 16  }
0x2d70   :  { %3479 = vsyncadd [#allocation22], 4294967280 }
0x2d71   :  { %2557 = sfence }
0x2d72   :  { %2558 = vsyncpa [#allocation6], 1 }
0x2d73   :  { %2559 = vsyncpa [#allocation12], 1 }
0x2d74   :  { %2560 = vsyncpa [#allocation15], 1 }
0x2d75   :  { %2561 = vsyncpa [#allocation18], 1 }
0x2d76   :  { %2562 = vsyncpa [#allocation7], 1 }
0x2d77   :  { %2563 = vsyncpa [#allocation8], 1 }
0x2d78   :  { %2564 = vsyncpa [#allocation9], 1 }
0x2d79   :  { %2565 = vsyncpa [#allocation22], 1 }

</bundles_post_ra>
